<compile_context>
chip_gen: v5e
topology: v5e:2x2
jax: 0.10.0
libtpu: 0.0.40
codegen_flags: <defaults>
</compile_context>

<pallas_src>
import functools
import math

import jax
import jax.numpy as jnp
from jax.experimental import pallas as pl
from jax.experimental.pallas import tpu as pltpu


def _mha_kernel(q_ref, osa_ref, wq_ref, wk_ref, wv_ref, wout_ref,
                w1c_ref, w1o_ref, b1_ref, w2_ref, b2_ref, out_ref,
                *, n_heads, graph_size, key_dim, val_dim):
    H, G, Kd, Vd = n_heads, graph_size, key_dim, val_dim
    q = q_ref[...]                               # (R, Din), R = nb * G
    R = q.shape[0]
    nb = R // G                                  # batches handled by this block

    # ---- fused per-head Q/K/V projections (one MXU matmul per tensor) ----
    # 1/sqrt(key_dim) is folded into wq in the wrapper.
    Q = jnp.dot(q, wq_ref[...], preferred_element_type=jnp.float32)   # (R, H*Kd)
    K = jnp.dot(q, wk_ref[...], preferred_element_type=jnp.float32)   # (R, H*Kd)
    V = jnp.dot(q, wv_ref[...], preferred_element_type=jnp.float32)   # (R, H*Vd)

    # ---- compatibility Q @ K^T, assembled as (R, H*G): row (b,i), col (h,j) --
    rows = []
    for b in range(nb):
        qb = Q[b * G:(b + 1) * G, :]
        kb = K[b * G:(b + 1) * G, :]
        blocks = []
        for h in range(H):
            blocks.append(jax.lax.dot_general(
                qb[:, h * Kd:(h + 1) * Kd], kb[:, h * Kd:(h + 1) * Kd],
                (((1,), (1,)), ((), ())),
                preferred_element_type=jnp.float32))                  # (G, G)
        rows.append(jnp.concatenate(blocks, axis=1))                  # (G, H*G)
    y_compat = jnp.concatenate(rows, axis=0) if nb > 1 else rows[0]   # (R, H*G)

    # ---- score_aggr MLP on the MXU (block-diagonal-per-key weights) ----
    h1 = jnp.dot(y_compat, w1c_ref[...], preferred_element_type=jnp.float32)
    h1 = h1 + jnp.dot(osa_ref[...], w1o_ref[...],
                      preferred_element_type=jnp.float32)
    h1 = jnp.maximum(h1 + b1_ref[...], 0.0)                           # (R, H*G)
    att = jnp.dot(h1, w2_ref[...],
                  preferred_element_type=jnp.float32) + b2_ref[...]   # (R, H*G)

    # ---- per-head softmax (batched over all rows) + attention-weighted V ----
    head_cols = []
    for p in range(H):
        ap = att[:, p * G:(p + 1) * G]                                # (R, G)
        m = jnp.max(ap, axis=-1, keepdims=True)
        e = jnp.exp(ap - m)
        soft = e / jnp.sum(e, axis=-1, keepdims=True)
        parts = []
        for b in range(nb):
            parts.append(jnp.dot(
                soft[b * G:(b + 1) * G, :],
                V[b * G:(b + 1) * G, p * Vd:(p + 1) * Vd],
                preferred_element_type=jnp.float32))                  # (G, Vd)
        head_cols.append(jnp.concatenate(parts, axis=0) if nb > 1 else parts[0])
    heads = jnp.concatenate(head_cols, axis=1)                        # (R, H*Vd)

    # ---- fused output projection ----
    out = jnp.dot(heads, wout_ref[...], preferred_element_type=jnp.float32)
    out_ref[...] = out.astype(out_ref.dtype)


def _full_spec(arr):
    nd = arr.ndim
    return pl.BlockSpec(arr.shape, lambda i, _nd=nd: (0,) * _nd)


def mha_forward(q, out_source_attn, params, *, batch_block=None):
    """Pallas implementation of MultiHeadAttentionNew.forward."""
    B, G, Din = q.shape
    Wq, Wk, Wv = params["W_query"], params["W_key"], params["W_val"]
    Wout = params["W_out"]
    W1, b1 = params["agg_w1"], params["agg_b1"]
    W2, b2 = params["agg_w2"], params["agg_b2"]
    H, _, Kd = Wq.shape
    Vd = Wv.shape[-1]
    E = Wout.shape[-1]
    norm = 1.0 / math.sqrt(Kd)

    # Head-fused projection / output weights (wrapper-side reshapes only).
    wq_cat = (Wq * norm).transpose(1, 0, 2).reshape(Din, H * Kd)   # norm folded in
    wk_cat = Wk.transpose(1, 0, 2).reshape(Din, H * Kd)
    wv_cat = Wv.transpose(1, 0, 2).reshape(Din, H * Vd)
    wout_cat = Wout.reshape(H * Vd, E)

    # score_aggr Linear(2H,H)/Linear(H,H) expanded block-diagonally over the key
    # axis j so the channel mix becomes plain (R, H*G) @ (H*G, H*G) matmuls.
    eye_g = jnp.eye(G, dtype=W1.dtype)
    w1c_big = jnp.einsum("oh,jk->hjok", W1[:, :H], eye_g).reshape(H * G, H * G)
    w1o_big = jnp.einsum("oh,jk->hjok", W1[:, H:], eye_g).reshape(H * G, H * G)
    w2_big = jnp.einsum("po,jk->ojpk", W2, eye_g).reshape(H * G, H * G)
    b1_big = jnp.repeat(b1, G)[None, :]                              # (1, H*G)
    b2_big = jnp.repeat(b2, G)[None, :]                              # (1, H*G)

    q2d = q.reshape(B * G, Din)                                      # free reshape
    # (H, B, G, G) -> (B*G, H*G): row (b, i), col (h, j)
    osa_y = jnp.transpose(out_source_attn, (1, 2, 0, 3)).reshape(B * G, H * G)

    # One grid step covers the whole (tiny) batch on single-TC chips (v5e/v6e);
    # on v7x pass batch_block=B//2 to feed both TensorCores.
    if batch_block is None:
        batch_block = B
    n_steps = B // batch_block
    rb = batch_block * G

    kernel = functools.partial(_mha_kernel, n_heads=H, graph_size=G,
                               key_dim=Kd, val_dim=Vd)

    out2d = pl.pallas_call(
        kernel,
        out_shape=jax.ShapeDtypeStruct((B * G, E), q.dtype),
        grid=(n_steps,),
        in_specs=[
            pl.BlockSpec((rb, Din), lambda i: (i, 0)),        # q rows
            pl.BlockSpec((rb, H * G), lambda i: (i, 0)),      # out_source_attn rows
            _full_spec(wq_cat), _full_spec(wk_cat), _full_spec(wv_cat),
            _full_spec(wout_cat),
            _full_spec(w1c_big), _full_spec(w1o_big), _full_spec(b1_big),
            _full_spec(w2_big), _full_spec(b2_big),
        ],
        out_specs=pl.BlockSpec((rb, E), lambda i: (i, 0)),
        compiler_params=pltpu.CompilerParams(
            dimension_semantics=("parallel",)),
    )(q2d, osa_y, wq_cat, wk_cat, wv_cat, wout_cat,
      w1c_big, w1o_big, b1_big, w2_big, b2_big)

    return out2d.reshape(B, G, E), out_source_attn


def init_params(key, n_heads, input_dim, embed_dim):
    """Deterministic uniform(-1/sqrt(size(-1)), +...) init, matching init_parameters()."""
    key_dim = val_dim = embed_dim // n_heads
    ks = jax.random.split(key, 8)

    def u(k, shape):
        stdv = 1.0 / math.sqrt(shape[-1])
        return jax.random.uniform(k, shape, jnp.float32, -stdv, stdv)

    return {
        "W_query": u(ks[0], (n_heads, input_dim, key_dim)),
        "W_key":   u(ks[1], (n_heads, input_dim, key_dim)),
        "W_val":   u(ks[2], (n_heads, input_dim, val_dim)),
        "agg_w1":  u(ks[3], (n_heads, 2 * n_heads)),   # Linear(16, 8).weight
        "agg_b1":  u(ks[4], (n_heads,)),
        "agg_w2":  u(ks[5], (n_heads, n_heads)),       # Linear(8, 8).weight
        "agg_b2":  u(ks[6], (n_heads,)),
        "W_out":   u(ks[7], (n_heads, key_dim, embed_dim)),
    }


def reference_forward(q, out_source_attn, p):
    """Pure-JAX transcription of the PyTorch forward (for correctness check)."""
    B, G, D = q.shape
    H, _, Kd = p["W_query"].shape
    E = p["W_out"].shape[-1]
    norm = 1.0 / math.sqrt(Kd)

    hflat = q.reshape(-1, D)
    Q = jnp.matmul(hflat, p["W_query"]).reshape(H, B, G, -1)
    K = jnp.matmul(hflat, p["W_key"]).reshape(H, B, G, -1)
    V = jnp.matmul(hflat, p["W_val"]).reshape(H, B, G, -1)

    compat = jnp.matmul(Q, jnp.swapaxes(K, 2, 3)) * norm
    compat = jnp.concatenate([compat, out_source_attn], axis=0)     # (2H,B,G,G)
    x = jnp.transpose(compat, (1, 2, 3, 0))                         # (B,G,G,2H)
    h1 = jnp.maximum(x @ p["agg_w1"].T + p["agg_b1"], 0.0)
    h2 = h1 @ p["agg_w2"].T + p["agg_b2"]
    attn = jnp.transpose(h2, (3, 0, 1, 2))                          # (H,B,G,G)
    heads = jnp.matmul(jax.nn.softmax(attn, axis=-1), V)            # (H,B,G,V)
    hp = jnp.transpose(heads, (1, 2, 0, 3)).reshape(-1, H * V.shape[-1])
    out = hp @ p["W_out"].reshape(-1, E)
    return out.reshape(B, G, E), out_source_attn


if __name__ == "__main__":
    B, G = 2, 8
    n_heads = 8          # the view(shp) with a literal 8 requires n_heads == 8
    input_dim = 32
    embed_dim = 32       # key_dim = val_dim = 4

    key = jax.random.PRNGKey(0)
    kq, ko, kp = jax.random.split(key, 3)
    q = jax.random.normal(kq, (B, G, input_dim), jnp.float32)
    out_source_attn = jax.random.normal(ko, (n_heads, B, G, G), jnp.float32)
    params = init_params(kp, n_heads, input_dim, embed_dim)

    out, osa_out = mha_forward(q, out_source_attn, params)
    out = jax.block_until_ready(out)

    ref_out, _ = reference_forward(q, out_source_attn, params)
    assert out.shape == (B, G, embed_dim)
    assert jnp.allclose(out, ref_out, rtol=1e-4, atol=1e-4), (
        float(jnp.max(jnp.abs(out - ref_out))))
    assert jnp.array_equal(osa_out, out_source_attn)

    print("KERNEL_OK")
</pallas_src>

<mosaic_0001>
module attributes {stable_mosaic.version = 11 : i64} {
  func.func @_mha_kernel(%arg0: i32, %arg1: memref<16x32xf32, #tpu.memory_space<vmem>>, %arg2: memref<16x64xf32, #tpu.memory_space<vmem>>, %arg3: memref<32x32xf32, #tpu.memory_space<vmem>>, %arg4: memref<32x32xf32, #tpu.memory_space<vmem>>, %arg5: memref<32x32xf32, #tpu.memory_space<vmem>>, %arg6: memref<32x32xf32, #tpu.memory_space<vmem>>, %arg7: memref<64x64xf32, #tpu.memory_space<vmem>>, %arg8: memref<64x64xf32, #tpu.memory_space<vmem>>, %arg9: memref<1x64xf32, #tpu.memory_space<vmem>>, %arg10: memref<64x64xf32, #tpu.memory_space<vmem>>, %arg11: memref<1x64xf32, #tpu.memory_space<vmem>>, %arg12: memref<16x32xf32, #tpu.memory_space<vmem>>) attributes {dimension_semantics = [#tpu.dimension_semantics<parallel>], iteration_bounds = array<i64: 1>, scalar_prefetch = 0 : i64, scratch_operands = 0 : i64, tpu.core_type = #tpu.core_type<tc>, window_params = [{transform_indices = @transform_0, window_bounds = array<i64: 16, 32>}, {transform_indices = @transform_1, window_bounds = array<i64: 16, 64>}, {pipeline_mode = #tpu.pipeline_mode<synchronous>, transform_indices = @transform_2, window_bounds = array<i64: 32, 32>}, {pipeline_mode = #tpu.pipeline_mode<synchronous>, transform_indices = @transform_3, window_bounds = array<i64: 32, 32>}, {pipeline_mode = #tpu.pipeline_mode<synchronous>, transform_indices = @transform_4, window_bounds = array<i64: 32, 32>}, {pipeline_mode = #tpu.pipeline_mode<synchronous>, transform_indices = @transform_5, window_bounds = array<i64: 32, 32>}, {pipeline_mode = #tpu.pipeline_mode<synchronous>, transform_indices = @transform_6, window_bounds = array<i64: 64, 64>}, {pipeline_mode = #tpu.pipeline_mode<synchronous>, transform_indices = @transform_7, window_bounds = array<i64: 64, 64>}, {pipeline_mode = #tpu.pipeline_mode<synchronous>, transform_indices = @transform_8, window_bounds = array<i64: 1, 64>}, {pipeline_mode = #tpu.pipeline_mode<synchronous>, transform_indices = @transform_9, window_bounds = array<i64: 64, 64>}, {pipeline_mode = #tpu.pipeline_mode<synchronous>, transform_indices = @transform_10, window_bounds = array<i64: 1, 64>}, {transform_indices = @transform_11, window_bounds = array<i64: 16, 32>}]} {
    %c0 = arith.constant 0 : index
    %c0_0 = arith.constant 0 : index
    %0 = vector.load %arg1[%c0, %c0_0] : memref<16x32xf32, #tpu.memory_space<vmem>>, vector<16x32xf32>
    %c0_1 = arith.constant 0 : index
    %c0_2 = arith.constant 0 : index
    %1 = vector.load %arg3[%c0_1, %c0_2] : memref<32x32xf32, #tpu.memory_space<vmem>>, vector<32x32xf32>
    %cst = arith.constant dense<0.000000e+00> : vector<16x32xf32>
    %2 = tpu.matmul %0, %1, %cst {dimension_numbers = #tpu.dot_dimension_numbers<[1], [0], [0], [1], [0, 0, 1, 1], [], []>} : vector<16x32xf32>, vector<32x32xf32>, vector<16x32xf32> -> vector<16x32xf32>
    %c0_3 = arith.constant 0 : index
    %c0_4 = arith.constant 0 : index
    %3 = vector.load %arg4[%c0_3, %c0_4] : memref<32x32xf32, #tpu.memory_space<vmem>>, vector<32x32xf32>
    %cst_5 = arith.constant dense<0.000000e+00> : vector<16x32xf32>
    %4 = tpu.matmul %0, %3, %cst_5 {dimension_numbers = #tpu.dot_dimension_numbers<[1], [0], [0], [1], [0, 0, 1, 1], [], []>} : vector<16x32xf32>, vector<32x32xf32>, vector<16x32xf32> -> vector<16x32xf32>
    %c0_6 = arith.constant 0 : index
    %c0_7 = arith.constant 0 : index
    %5 = vector.load %arg5[%c0_6, %c0_7] : memref<32x32xf32, #tpu.memory_space<vmem>>, vector<32x32xf32>
    %cst_8 = arith.constant dense<0.000000e+00> : vector<16x32xf32>
    %6 = tpu.matmul %0, %5, %cst_8 {dimension_numbers = #tpu.dot_dimension_numbers<[1], [0], [0], [1], [0, 0, 1, 1], [], []>} : vector<16x32xf32>, vector<32x32xf32>, vector<16x32xf32> -> vector<16x32xf32>
    %7 = vector.extract_strided_slice %2 {offsets = [0, 0], sizes = [8, 32], strides = [1, 1]} : vector<16x32xf32> to vector<8x32xf32>
    %8 = vector.extract_strided_slice %4 {offsets = [0, 0], sizes = [8, 32], strides = [1, 1]} : vector<16x32xf32> to vector<8x32xf32>
    %9 = vector.extract_strided_slice %7 {offsets = [0, 0], sizes = [8, 4], strides = [1, 1]} : vector<8x32xf32> to vector<8x4xf32>
    %10 = vector.extract_strided_slice %8 {offsets = [0, 0], sizes = [8, 4], strides = [1, 1]} : vector<8x32xf32> to vector<8x4xf32>
    %cst_9 = arith.constant dense<0.000000e+00> : vector<8x8xf32>
    %11 = tpu.matmul %9, %10, %cst_9 {dimension_numbers = #tpu.dot_dimension_numbers<[1], [1], [0], [0], [0, 0, 1, 0], [], []>} : vector<8x4xf32>, vector<8x4xf32>, vector<8x8xf32> -> vector<8x8xf32>
    %12 = vector.extract_strided_slice %7 {offsets = [0, 4], sizes = [8, 4], strides = [1, 1]} : vector<8x32xf32> to vector<8x4xf32>
    %13 = vector.extract_strided_slice %8 {offsets = [0, 4], sizes = [8, 4], strides = [1, 1]} : vector<8x32xf32> to vector<8x4xf32>
    %cst_10 = arith.constant dense<0.000000e+00> : vector<8x8xf32>
    %14 = tpu.matmul %12, %13, %cst_10 {dimension_numbers = #tpu.dot_dimension_numbers<[1], [1], [0], [0], [0, 0, 1, 0], [], []>} : vector<8x4xf32>, vector<8x4xf32>, vector<8x8xf32> -> vector<8x8xf32>
    %15 = vector.extract_strided_slice %7 {offsets = [0, 8], sizes = [8, 4], strides = [1, 1]} : vector<8x32xf32> to vector<8x4xf32>
    %16 = vector.extract_strided_slice %8 {offsets = [0, 8], sizes = [8, 4], strides = [1, 1]} : vector<8x32xf32> to vector<8x4xf32>
    %cst_11 = arith.constant dense<0.000000e+00> : vector<8x8xf32>
    %17 = tpu.matmul %15, %16, %cst_11 {dimension_numbers = #tpu.dot_dimension_numbers<[1], [1], [0], [0], [0, 0, 1, 0], [], []>} : vector<8x4xf32>, vector<8x4xf32>, vector<8x8xf32> -> vector<8x8xf32>
    %18 = vector.extract_strided_slice %7 {offsets = [0, 12], sizes = [8, 4], strides = [1, 1]} : vector<8x32xf32> to vector<8x4xf32>
    %19 = vector.extract_strided_slice %8 {offsets = [0, 12], sizes = [8, 4], strides = [1, 1]} : vector<8x32xf32> to vector<8x4xf32>
    %cst_12 = arith.constant dense<0.000000e+00> : vector<8x8xf32>
    %20 = tpu.matmul %18, %19, %cst_12 {dimension_numbers = #tpu.dot_dimension_numbers<[1], [1], [0], [0], [0, 0, 1, 0], [], []>} : vector<8x4xf32>, vector<8x4xf32>, vector<8x8xf32> -> vector<8x8xf32>
    %21 = vector.extract_strided_slice %7 {offsets = [0, 16], sizes = [8, 4], strides = [1, 1]} : vector<8x32xf32> to vector<8x4xf32>
    %22 = vector.extract_strided_slice %8 {offsets = [0, 16], sizes = [8, 4], strides = [1, 1]} : vector<8x32xf32> to vector<8x4xf32>
    %cst_13 = arith.constant dense<0.000000e+00> : vector<8x8xf32>
    %23 = tpu.matmul %21, %22, %cst_13 {dimension_numbers = #tpu.dot_dimension_numbers<[1], [1], [0], [0], [0, 0, 1, 0], [], []>} : vector<8x4xf32>, vector<8x4xf32>, vector<8x8xf32> -> vector<8x8xf32>
    %24 = vector.extract_strided_slice %7 {offsets = [0, 20], sizes = [8, 4], strides = [1, 1]} : vector<8x32xf32> to vector<8x4xf32>
    %25 = vector.extract_strided_slice %8 {offsets = [0, 20], sizes = [8, 4], strides = [1, 1]} : vector<8x32xf32> to vector<8x4xf32>
    %cst_14 = arith.constant dense<0.000000e+00> : vector<8x8xf32>
    %26 = tpu.matmul %24, %25, %cst_14 {dimension_numbers = #tpu.dot_dimension_numbers<[1], [1], [0], [0], [0, 0, 1, 0], [], []>} : vector<8x4xf32>, vector<8x4xf32>, vector<8x8xf32> -> vector<8x8xf32>
    %27 = vector.extract_strided_slice %7 {offsets = [0, 24], sizes = [8, 4], strides = [1, 1]} : vector<8x32xf32> to vector<8x4xf32>
    %28 = vector.extract_strided_slice %8 {offsets = [0, 24], sizes = [8, 4], strides = [1, 1]} : vector<8x32xf32> to vector<8x4xf32>
    %cst_15 = arith.constant dense<0.000000e+00> : vector<8x8xf32>
    %29 = tpu.matmul %27, %28, %cst_15 {dimension_numbers = #tpu.dot_dimension_numbers<[1], [1], [0], [0], [0, 0, 1, 0], [], []>} : vector<8x4xf32>, vector<8x4xf32>, vector<8x8xf32> -> vector<8x8xf32>
    %30 = vector.extract_strided_slice %7 {offsets = [0, 28], sizes = [8, 4], strides = [1, 1]} : vector<8x32xf32> to vector<8x4xf32>
    %31 = vector.extract_strided_slice %8 {offsets = [0, 28], sizes = [8, 4], strides = [1, 1]} : vector<8x32xf32> to vector<8x4xf32>
    %cst_16 = arith.constant dense<0.000000e+00> : vector<8x8xf32>
    %32 = tpu.matmul %30, %31, %cst_16 {dimension_numbers = #tpu.dot_dimension_numbers<[1], [1], [0], [0], [0, 0, 1, 0], [], []>} : vector<8x4xf32>, vector<8x4xf32>, vector<8x8xf32> -> vector<8x8xf32>
    %33 = tpu.concatenate %11, %14, %17, %20, %23, %26, %29, %32 in 1 : vector<8x8xf32>, vector<8x8xf32>, vector<8x8xf32>, vector<8x8xf32>, vector<8x8xf32>, vector<8x8xf32>, vector<8x8xf32>, vector<8x8xf32> -> vector<8x64xf32>
    %34 = vector.extract_strided_slice %2 {offsets = [8, 0], sizes = [8, 32], strides = [1, 1]} : vector<16x32xf32> to vector<8x32xf32>
    %35 = vector.extract_strided_slice %4 {offsets = [8, 0], sizes = [8, 32], strides = [1, 1]} : vector<16x32xf32> to vector<8x32xf32>
    %36 = vector.extract_strided_slice %34 {offsets = [0, 0], sizes = [8, 4], strides = [1, 1]} : vector<8x32xf32> to vector<8x4xf32>
    %37 = vector.extract_strided_slice %35 {offsets = [0, 0], sizes = [8, 4], strides = [1, 1]} : vector<8x32xf32> to vector<8x4xf32>
    %cst_17 = arith.constant dense<0.000000e+00> : vector<8x8xf32>
    %38 = tpu.matmul %36, %37, %cst_17 {dimension_numbers = #tpu.dot_dimension_numbers<[1], [1], [0], [0], [0, 0, 1, 0], [], []>} : vector<8x4xf32>, vector<8x4xf32>, vector<8x8xf32> -> vector<8x8xf32>
    %39 = vector.extract_strided_slice %34 {offsets = [0, 4], sizes = [8, 4], strides = [1, 1]} : vector<8x32xf32> to vector<8x4xf32>
    %40 = vector.extract_strided_slice %35 {offsets = [0, 4], sizes = [8, 4], strides = [1, 1]} : vector<8x32xf32> to vector<8x4xf32>
    %cst_18 = arith.constant dense<0.000000e+00> : vector<8x8xf32>
    %41 = tpu.matmul %39, %40, %cst_18 {dimension_numbers = #tpu.dot_dimension_numbers<[1], [1], [0], [0], [0, 0, 1, 0], [], []>} : vector<8x4xf32>, vector<8x4xf32>, vector<8x8xf32> -> vector<8x8xf32>
    %42 = vector.extract_strided_slice %34 {offsets = [0, 8], sizes = [8, 4], strides = [1, 1]} : vector<8x32xf32> to vector<8x4xf32>
    %43 = vector.extract_strided_slice %35 {offsets = [0, 8], sizes = [8, 4], strides = [1, 1]} : vector<8x32xf32> to vector<8x4xf32>
    %cst_19 = arith.constant dense<0.000000e+00> : vector<8x8xf32>
    %44 = tpu.matmul %42, %43, %cst_19 {dimension_numbers = #tpu.dot_dimension_numbers<[1], [1], [0], [0], [0, 0, 1, 0], [], []>} : vector<8x4xf32>, vector<8x4xf32>, vector<8x8xf32> -> vector<8x8xf32>
    %45 = vector.extract_strided_slice %34 {offsets = [0, 12], sizes = [8, 4], strides = [1, 1]} : vector<8x32xf32> to vector<8x4xf32>
    %46 = vector.extract_strided_slice %35 {offsets = [0, 12], sizes = [8, 4], strides = [1, 1]} : vector<8x32xf32> to vector<8x4xf32>
    %cst_20 = arith.constant dense<0.000000e+00> : vector<8x8xf32>
    %47 = tpu.matmul %45, %46, %cst_20 {dimension_numbers = #tpu.dot_dimension_numbers<[1], [1], [0], [0], [0, 0, 1, 0], [], []>} : vector<8x4xf32>, vector<8x4xf32>, vector<8x8xf32> -> vector<8x8xf32>
    %48 = vector.extract_strided_slice %34 {offsets = [0, 16], sizes = [8, 4], strides = [1, 1]} : vector<8x32xf32> to vector<8x4xf32>
    %49 = vector.extract_strided_slice %35 {offsets = [0, 16], sizes = [8, 4], strides = [1, 1]} : vector<8x32xf32> to vector<8x4xf32>
    %cst_21 = arith.constant dense<0.000000e+00> : vector<8x8xf32>
    %50 = tpu.matmul %48, %49, %cst_21 {dimension_numbers = #tpu.dot_dimension_numbers<[1], [1], [0], [0], [0, 0, 1, 0], [], []>} : vector<8x4xf32>, vector<8x4xf32>, vector<8x8xf32> -> vector<8x8xf32>
    %51 = vector.extract_strided_slice %34 {offsets = [0, 20], sizes = [8, 4], strides = [1, 1]} : vector<8x32xf32> to vector<8x4xf32>
    %52 = vector.extract_strided_slice %35 {offsets = [0, 20], sizes = [8, 4], strides = [1, 1]} : vector<8x32xf32> to vector<8x4xf32>
    %cst_22 = arith.constant dense<0.000000e+00> : vector<8x8xf32>
    %53 = tpu.matmul %51, %52, %cst_22 {dimension_numbers = #tpu.dot_dimension_numbers<[1], [1], [0], [0], [0, 0, 1, 0], [], []>} : vector<8x4xf32>, vector<8x4xf32>, vector<8x8xf32> -> vector<8x8xf32>
    %54 = vector.extract_strided_slice %34 {offsets = [0, 24], sizes = [8, 4], strides = [1, 1]} : vector<8x32xf32> to vector<8x4xf32>
    %55 = vector.extract_strided_slice %35 {offsets = [0, 24], sizes = [8, 4], strides = [1, 1]} : vector<8x32xf32> to vector<8x4xf32>
    %cst_23 = arith.constant dense<0.000000e+00> : vector<8x8xf32>
    %56 = tpu.matmul %54, %55, %cst_23 {dimension_numbers = #tpu.dot_dimension_numbers<[1], [1], [0], [0], [0, 0, 1, 0], [], []>} : vector<8x4xf32>, vector<8x4xf32>, vector<8x8xf32> -> vector<8x8xf32>
    %57 = vector.extract_strided_slice %34 {offsets = [0, 28], sizes = [8, 4], strides = [1, 1]} : vector<8x32xf32> to vector<8x4xf32>
    %58 = vector.extract_strided_slice %35 {offsets = [0, 28], sizes = [8, 4], strides = [1, 1]} : vector<8x32xf32> to vector<8x4xf32>
    %cst_24 = arith.constant dense<0.000000e+00> : vector<8x8xf32>
    %59 = tpu.matmul %57, %58, %cst_24 {dimension_numbers = #tpu.dot_dimension_numbers<[1], [1], [0], [0], [0, 0, 1, 0], [], []>} : vector<8x4xf32>, vector<8x4xf32>, vector<8x8xf32> -> vector<8x8xf32>
    %60 = tpu.concatenate %38, %41, %44, %47, %50, %53, %56, %59 in 1 : vector<8x8xf32>, vector<8x8xf32>, vector<8x8xf32>, vector<8x8xf32>, vector<8x8xf32>, vector<8x8xf32>, vector<8x8xf32>, vector<8x8xf32> -> vector<8x64xf32>
    %61 = tpu.concatenate %33, %60 in 0 : vector<8x64xf32>, vector<8x64xf32> -> vector<16x64xf32>
    %c0_25 = arith.constant 0 : index
    %c0_26 = arith.constant 0 : index
    %62 = vector.load %arg7[%c0_25, %c0_26] : memref<64x64xf32, #tpu.memory_space<vmem>>, vector<64x64xf32>
    %cst_27 = arith.constant dense<0.000000e+00> : vector<16x64xf32>
    %63 = tpu.matmul %61, %62, %cst_27 {dimension_numbers = #tpu.dot_dimension_numbers<[1], [0], [0], [1], [0, 0, 1, 1], [], []>} : vector<16x64xf32>, vector<64x64xf32>, vector<16x64xf32> -> vector<16x64xf32>
    %c0_28 = arith.constant 0 : index
    %c0_29 = arith.constant 0 : index
    %64 = vector.load %arg2[%c0_28, %c0_29] : memref<16x64xf32, #tpu.memory_space<vmem>>, vector<16x64xf32>
    %c0_30 = arith.constant 0 : index
    %c0_31 = arith.constant 0 : index
    %65 = vector.load %arg8[%c0_30, %c0_31] : memref<64x64xf32, #tpu.memory_space<vmem>>, vector<64x64xf32>
    %cst_32 = arith.constant dense<0.000000e+00> : vector<16x64xf32>
    %66 = tpu.matmul %64, %65, %cst_32 {dimension_numbers = #tpu.dot_dimension_numbers<[1], [0], [0], [1], [0, 0, 1, 1], [], []>} : vector<16x64xf32>, vector<64x64xf32>, vector<16x64xf32> -> vector<16x64xf32>
    %67 = arith.addf %63, %66 : vector<16x64xf32>
    %c0_33 = arith.constant 0 : index
    %c0_34 = arith.constant 0 : index
    %68 = vector.load %arg9[%c0_33, %c0_34] : memref<1x64xf32, #tpu.memory_space<vmem>>, vector<1x64xf32>
    %69 = vector.broadcast %68 : vector<1x64xf32> to vector<16x64xf32>
    %70 = arith.addf %67, %69 : vector<16x64xf32>
    %cst_35 = arith.constant 0.000000e+00 : f32
    %71 = vector.broadcast %cst_35 : f32 to vector<16x64xf32>
    %72 = arith.maximumf %70, %71 : vector<16x64xf32>
    %c0_36 = arith.constant 0 : index
    %c0_37 = arith.constant 0 : index
    %73 = vector.load %arg10[%c0_36, %c0_37] : memref<64x64xf32, #tpu.memory_space<vmem>>, vector<64x64xf32>
    %cst_38 = arith.constant dense<0.000000e+00> : vector<16x64xf32>
    %74 = tpu.matmul %72, %73, %cst_38 {dimension_numbers = #tpu.dot_dimension_numbers<[1], [0], [0], [1], [0, 0, 1, 1], [], []>} : vector<16x64xf32>, vector<64x64xf32>, vector<16x64xf32> -> vector<16x64xf32>
    %c0_39 = arith.constant 0 : index
    %c0_40 = arith.constant 0 : index
    %75 = vector.load %arg11[%c0_39, %c0_40] : memref<1x64xf32, #tpu.memory_space<vmem>>, vector<1x64xf32>
    %76 = vector.broadcast %75 : vector<1x64xf32> to vector<16x64xf32>
    %77 = arith.addf %74, %76 : vector<16x64xf32>
    %78 = vector.extract_strided_slice %77 {offsets = [0, 0], sizes = [16, 8], strides = [1, 1]} : vector<16x64xf32> to vector<16x8xf32>
    %cst_41 = arith.constant dense<0xFF800000> : vector<16xf32>
    %79 = vector.multi_reduction <maximumf>, %78, %cst_41 [1] : vector<16x8xf32> to vector<16xf32>
    %80 = vector.shape_cast %79 : vector<16xf32> to vector<16x1xf32>
    %81 = vector.broadcast %80 : vector<16x1xf32> to vector<16x8xf32>
    %82 = arith.subf %78, %81 : vector<16x8xf32>
    %83 = math.exp %82 : vector<16x8xf32>
    %cst_42 = arith.constant dense<0.000000e+00> : vector<16xf32>
    %84 = vector.multi_reduction <add>, %83, %cst_42 [1] : vector<16x8xf32> to vector<16xf32>
    %85 = vector.shape_cast %84 : vector<16xf32> to vector<16x1xf32>
    %86 = vector.broadcast %85 : vector<16x1xf32> to vector<16x8xf32>
    %87 = arith.divf %83, %86 : vector<16x8xf32>
    %88 = vector.extract_strided_slice %87 {offsets = [0, 0], sizes = [8, 8], strides = [1, 1]} : vector<16x8xf32> to vector<8x8xf32>
    %89 = vector.extract_strided_slice %6 {offsets = [0, 0], sizes = [8, 4], strides = [1, 1]} : vector<16x32xf32> to vector<8x4xf32>
    %cst_43 = arith.constant dense<0.000000e+00> : vector<8x4xf32>
    %90 = tpu.matmul %88, %89, %cst_43 {dimension_numbers = #tpu.dot_dimension_numbers<[1], [0], [0], [1], [0, 0, 1, 1], [], []>} : vector<8x8xf32>, vector<8x4xf32>, vector<8x4xf32> -> vector<8x4xf32>
    %91 = vector.extract_strided_slice %87 {offsets = [8, 0], sizes = [8, 8], strides = [1, 1]} : vector<16x8xf32> to vector<8x8xf32>
    %92 = vector.extract_strided_slice %6 {offsets = [8, 0], sizes = [8, 4], strides = [1, 1]} : vector<16x32xf32> to vector<8x4xf32>
    %cst_44 = arith.constant dense<0.000000e+00> : vector<8x4xf32>
    %93 = tpu.matmul %91, %92, %cst_44 {dimension_numbers = #tpu.dot_dimension_numbers<[1], [0], [0], [1], [0, 0, 1, 1], [], []>} : vector<8x8xf32>, vector<8x4xf32>, vector<8x4xf32> -> vector<8x4xf32>
    %94 = tpu.concatenate %90, %93 in 0 : vector<8x4xf32>, vector<8x4xf32> -> vector<16x4xf32>
    %95 = vector.extract_strided_slice %77 {offsets = [0, 8], sizes = [16, 8], strides = [1, 1]} : vector<16x64xf32> to vector<16x8xf32>
    %cst_45 = arith.constant dense<0xFF800000> : vector<16xf32>
    %96 = vector.multi_reduction <maximumf>, %95, %cst_45 [1] : vector<16x8xf32> to vector<16xf32>
    %97 = vector.shape_cast %96 : vector<16xf32> to vector<16x1xf32>
    %98 = vector.broadcast %97 : vector<16x1xf32> to vector<16x8xf32>
    %99 = arith.subf %95, %98 : vector<16x8xf32>
    %100 = math.exp %99 : vector<16x8xf32>
    %cst_46 = arith.constant dense<0.000000e+00> : vector<16xf32>
    %101 = vector.multi_reduction <add>, %100, %cst_46 [1] : vector<16x8xf32> to vector<16xf32>
    %102 = vector.shape_cast %101 : vector<16xf32> to vector<16x1xf32>
    %103 = vector.broadcast %102 : vector<16x1xf32> to vector<16x8xf32>
    %104 = arith.divf %100, %103 : vector<16x8xf32>
    %105 = vector.extract_strided_slice %104 {offsets = [0, 0], sizes = [8, 8], strides = [1, 1]} : vector<16x8xf32> to vector<8x8xf32>
    %106 = vector.extract_strided_slice %6 {offsets = [0, 4], sizes = [8, 4], strides = [1, 1]} : vector<16x32xf32> to vector<8x4xf32>
    %cst_47 = arith.constant dense<0.000000e+00> : vector<8x4xf32>
    %107 = tpu.matmul %105, %106, %cst_47 {dimension_numbers = #tpu.dot_dimension_numbers<[1], [0], [0], [1], [0, 0, 1, 1], [], []>} : vector<8x8xf32>, vector<8x4xf32>, vector<8x4xf32> -> vector<8x4xf32>
    %108 = vector.extract_strided_slice %104 {offsets = [8, 0], sizes = [8, 8], strides = [1, 1]} : vector<16x8xf32> to vector<8x8xf32>
    %109 = vector.extract_strided_slice %6 {offsets = [8, 4], sizes = [8, 4], strides = [1, 1]} : vector<16x32xf32> to vector<8x4xf32>
    %cst_48 = arith.constant dense<0.000000e+00> : vector<8x4xf32>
    %110 = tpu.matmul %108, %109, %cst_48 {dimension_numbers = #tpu.dot_dimension_numbers<[1], [0], [0], [1], [0, 0, 1, 1], [], []>} : vector<8x8xf32>, vector<8x4xf32>, vector<8x4xf32> -> vector<8x4xf32>
    %111 = tpu.concatenate %107, %110 in 0 : vector<8x4xf32>, vector<8x4xf32> -> vector<16x4xf32>
    %112 = vector.extract_strided_slice %77 {offsets = [0, 16], sizes = [16, 8], strides = [1, 1]} : vector<16x64xf32> to vector<16x8xf32>
    %cst_49 = arith.constant dense<0xFF800000> : vector<16xf32>
    %113 = vector.multi_reduction <maximumf>, %112, %cst_49 [1] : vector<16x8xf32> to vector<16xf32>
    %114 = vector.shape_cast %113 : vector<16xf32> to vector<16x1xf32>
    %115 = vector.broadcast %114 : vector<16x1xf32> to vector<16x8xf32>
    %116 = arith.subf %112, %115 : vector<16x8xf32>
    %117 = math.exp %116 : vector<16x8xf32>
    %cst_50 = arith.constant dense<0.000000e+00> : vector<16xf32>
    %118 = vector.multi_reduction <add>, %117, %cst_50 [1] : vector<16x8xf32> to vector<16xf32>
    %119 = vector.shape_cast %118 : vector<16xf32> to vector<16x1xf32>
    %120 = vector.broadcast %119 : vector<16x1xf32> to vector<16x8xf32>
    %121 = arith.divf %117, %120 : vector<16x8xf32>
    %122 = vector.extract_strided_slice %121 {offsets = [0, 0], sizes = [8, 8], strides = [1, 1]} : vector<16x8xf32> to vector<8x8xf32>
    %123 = vector.extract_strided_slice %6 {offsets = [0, 8], sizes = [8, 4], strides = [1, 1]} : vector<16x32xf32> to vector<8x4xf32>
    %cst_51 = arith.constant dense<0.000000e+00> : vector<8x4xf32>
    %124 = tpu.matmul %122, %123, %cst_51 {dimension_numbers = #tpu.dot_dimension_numbers<[1], [0], [0], [1], [0, 0, 1, 1], [], []>} : vector<8x8xf32>, vector<8x4xf32>, vector<8x4xf32> -> vector<8x4xf32>
    %125 = vector.extract_strided_slice %121 {offsets = [8, 0], sizes = [8, 8], strides = [1, 1]} : vector<16x8xf32> to vector<8x8xf32>
    %126 = vector.extract_strided_slice %6 {offsets = [8, 8], sizes = [8, 4], strides = [1, 1]} : vector<16x32xf32> to vector<8x4xf32>
    %cst_52 = arith.constant dense<0.000000e+00> : vector<8x4xf32>
    %127 = tpu.matmul %125, %126, %cst_52 {dimension_numbers = #tpu.dot_dimension_numbers<[1], [0], [0], [1], [0, 0, 1, 1], [], []>} : vector<8x8xf32>, vector<8x4xf32>, vector<8x4xf32> -> vector<8x4xf32>
    %128 = tpu.concatenate %124, %127 in 0 : vector<8x4xf32>, vector<8x4xf32> -> vector<16x4xf32>
    %129 = vector.extract_strided_slice %77 {offsets = [0, 24], sizes = [16, 8], strides = [1, 1]} : vector<16x64xf32> to vector<16x8xf32>
    %cst_53 = arith.constant dense<0xFF800000> : vector<16xf32>
    %130 = vector.multi_reduction <maximumf>, %129, %cst_53 [1] : vector<16x8xf32> to vector<16xf32>
    %131 = vector.shape_cast %130 : vector<16xf32> to vector<16x1xf32>
    %132 = vector.broadcast %131 : vector<16x1xf32> to vector<16x8xf32>
    %133 = arith.subf %129, %132 : vector<16x8xf32>
    %134 = math.exp %133 : vector<16x8xf32>
    %cst_54 = arith.constant dense<0.000000e+00> : vector<16xf32>
    %135 = vector.multi_reduction <add>, %134, %cst_54 [1] : vector<16x8xf32> to vector<16xf32>
    %136 = vector.shape_cast %135 : vector<16xf32> to vector<16x1xf32>
    %137 = vector.broadcast %136 : vector<16x1xf32> to vector<16x8xf32>
    %138 = arith.divf %134, %137 : vector<16x8xf32>
    %139 = vector.extract_strided_slice %138 {offsets = [0, 0], sizes = [8, 8], strides = [1, 1]} : vector<16x8xf32> to vector<8x8xf32>
    %140 = vector.extract_strided_slice %6 {offsets = [0, 12], sizes = [8, 4], strides = [1, 1]} : vector<16x32xf32> to vector<8x4xf32>
    %cst_55 = arith.constant dense<0.000000e+00> : vector<8x4xf32>
    %141 = tpu.matmul %139, %140, %cst_55 {dimension_numbers = #tpu.dot_dimension_numbers<[1], [0], [0], [1], [0, 0, 1, 1], [], []>} : vector<8x8xf32>, vector<8x4xf32>, vector<8x4xf32> -> vector<8x4xf32>
    %142 = vector.extract_strided_slice %138 {offsets = [8, 0], sizes = [8, 8], strides = [1, 1]} : vector<16x8xf32> to vector<8x8xf32>
    %143 = vector.extract_strided_slice %6 {offsets = [8, 12], sizes = [8, 4], strides = [1, 1]} : vector<16x32xf32> to vector<8x4xf32>
    %cst_56 = arith.constant dense<0.000000e+00> : vector<8x4xf32>
    %144 = tpu.matmul %142, %143, %cst_56 {dimension_numbers = #tpu.dot_dimension_numbers<[1], [0], [0], [1], [0, 0, 1, 1], [], []>} : vector<8x8xf32>, vector<8x4xf32>, vector<8x4xf32> -> vector<8x4xf32>
    %145 = tpu.concatenate %141, %144 in 0 : vector<8x4xf32>, vector<8x4xf32> -> vector<16x4xf32>
    %146 = vector.extract_strided_slice %77 {offsets = [0, 32], sizes = [16, 8], strides = [1, 1]} : vector<16x64xf32> to vector<16x8xf32>
    %cst_57 = arith.constant dense<0xFF800000> : vector<16xf32>
    %147 = vector.multi_reduction <maximumf>, %146, %cst_57 [1] : vector<16x8xf32> to vector<16xf32>
    %148 = vector.shape_cast %147 : vector<16xf32> to vector<16x1xf32>
    %149 = vector.broadcast %148 : vector<16x1xf32> to vector<16x8xf32>
    %150 = arith.subf %146, %149 : vector<16x8xf32>
    %151 = math.exp %150 : vector<16x8xf32>
    %cst_58 = arith.constant dense<0.000000e+00> : vector<16xf32>
    %152 = vector.multi_reduction <add>, %151, %cst_58 [1] : vector<16x8xf32> to vector<16xf32>
    %153 = vector.shape_cast %152 : vector<16xf32> to vector<16x1xf32>
    %154 = vector.broadcast %153 : vector<16x1xf32> to vector<16x8xf32>
    %155 = arith.divf %151, %154 : vector<16x8xf32>
    %156 = vector.extract_strided_slice %155 {offsets = [0, 0], sizes = [8, 8], strides = [1, 1]} : vector<16x8xf32> to vector<8x8xf32>
    %157 = vector.extract_strided_slice %6 {offsets = [0, 16], sizes = [8, 4], strides = [1, 1]} : vector<16x32xf32> to vector<8x4xf32>
    %cst_59 = arith.constant dense<0.000000e+00> : vector<8x4xf32>
    %158 = tpu.matmul %156, %157, %cst_59 {dimension_numbers = #tpu.dot_dimension_numbers<[1], [0], [0], [1], [0, 0, 1, 1], [], []>} : vector<8x8xf32>, vector<8x4xf32>, vector<8x4xf32> -> vector<8x4xf32>
    %159 = vector.extract_strided_slice %155 {offsets = [8, 0], sizes = [8, 8], strides = [1, 1]} : vector<16x8xf32> to vector<8x8xf32>
    %160 = vector.extract_strided_slice %6 {offsets = [8, 16], sizes = [8, 4], strides = [1, 1]} : vector<16x32xf32> to vector<8x4xf32>
    %cst_60 = arith.constant dense<0.000000e+00> : vector<8x4xf32>
    %161 = tpu.matmul %159, %160, %cst_60 {dimension_numbers = #tpu.dot_dimension_numbers<[1], [0], [0], [1], [0, 0, 1, 1], [], []>} : vector<8x8xf32>, vector<8x4xf32>, vector<8x4xf32> -> vector<8x4xf32>
    %162 = tpu.concatenate %158, %161 in 0 : vector<8x4xf32>, vector<8x4xf32> -> vector<16x4xf32>
    %163 = vector.extract_strided_slice %77 {offsets = [0, 40], sizes = [16, 8], strides = [1, 1]} : vector<16x64xf32> to vector<16x8xf32>
    %cst_61 = arith.constant dense<0xFF800000> : vector<16xf32>
    %164 = vector.multi_reduction <maximumf>, %163, %cst_61 [1] : vector<16x8xf32> to vector<16xf32>
    %165 = vector.shape_cast %164 : vector<16xf32> to vector<16x1xf32>
    %166 = vector.broadcast %165 : vector<16x1xf32> to vector<16x8xf32>
    %167 = arith.subf %163, %166 : vector<16x8xf32>
    %168 = math.exp %167 : vector<16x8xf32>
    %cst_62 = arith.constant dense<0.000000e+00> : vector<16xf32>
    %169 = vector.multi_reduction <add>, %168, %cst_62 [1] : vector<16x8xf32> to vector<16xf32>
    %170 = vector.shape_cast %169 : vector<16xf32> to vector<16x1xf32>
    %171 = vector.broadcast %170 : vector<16x1xf32> to vector<16x8xf32>
    %172 = arith.divf %168, %171 : vector<16x8xf32>
    %173 = vector.extract_strided_slice %172 {offsets = [0, 0], sizes = [8, 8], strides = [1, 1]} : vector<16x8xf32> to vector<8x8xf32>
    %174 = vector.extract_strided_slice %6 {offsets = [0, 20], sizes = [8, 4], strides = [1, 1]} : vector<16x32xf32> to vector<8x4xf32>
    %cst_63 = arith.constant dense<0.000000e+00> : vector<8x4xf32>
    %175 = tpu.matmul %173, %174, %cst_63 {dimension_numbers = #tpu.dot_dimension_numbers<[1], [0], [0], [1], [0, 0, 1, 1], [], []>} : vector<8x8xf32>, vector<8x4xf32>, vector<8x4xf32> -> vector<8x4xf32>
    %176 = vector.extract_strided_slice %172 {offsets = [8, 0], sizes = [8, 8], strides = [1, 1]} : vector<16x8xf32> to vector<8x8xf32>
    %177 = vector.extract_strided_slice %6 {offsets = [8, 20], sizes = [8, 4], strides = [1, 1]} : vector<16x32xf32> to vector<8x4xf32>
    %cst_64 = arith.constant dense<0.000000e+00> : vector<8x4xf32>
    %178 = tpu.matmul %176, %177, %cst_64 {dimension_numbers = #tpu.dot_dimension_numbers<[1], [0], [0], [1], [0, 0, 1, 1], [], []>} : vector<8x8xf32>, vector<8x4xf32>, vector<8x4xf32> -> vector<8x4xf32>
    %179 = tpu.concatenate %175, %178 in 0 : vector<8x4xf32>, vector<8x4xf32> -> vector<16x4xf32>
    %180 = vector.extract_strided_slice %77 {offsets = [0, 48], sizes = [16, 8], strides = [1, 1]} : vector<16x64xf32> to vector<16x8xf32>
    %cst_65 = arith.constant dense<0xFF800000> : vector<16xf32>
    %181 = vector.multi_reduction <maximumf>, %180, %cst_65 [1] : vector<16x8xf32> to vector<16xf32>
    %182 = vector.shape_cast %181 : vector<16xf32> to vector<16x1xf32>
    %183 = vector.broadcast %182 : vector<16x1xf32> to vector<16x8xf32>
    %184 = arith.subf %180, %183 : vector<16x8xf32>
    %185 = math.exp %184 : vector<16x8xf32>
    %cst_66 = arith.constant dense<0.000000e+00> : vector<16xf32>
    %186 = vector.multi_reduction <add>, %185, %cst_66 [1] : vector<16x8xf32> to vector<16xf32>
    %187 = vector.shape_cast %186 : vector<16xf32> to vector<16x1xf32>
    %188 = vector.broadcast %187 : vector<16x1xf32> to vector<16x8xf32>
    %189 = arith.divf %185, %188 : vector<16x8xf32>
    %190 = vector.extract_strided_slice %189 {offsets = [0, 0], sizes = [8, 8], strides = [1, 1]} : vector<16x8xf32> to vector<8x8xf32>
    %191 = vector.extract_strided_slice %6 {offsets = [0, 24], sizes = [8, 4], strides = [1, 1]} : vector<16x32xf32> to vector<8x4xf32>
    %cst_67 = arith.constant dense<0.000000e+00> : vector<8x4xf32>
    %192 = tpu.matmul %190, %191, %cst_67 {dimension_numbers = #tpu.dot_dimension_numbers<[1], [0], [0], [1], [0, 0, 1, 1], [], []>} : vector<8x8xf32>, vector<8x4xf32>, vector<8x4xf32> -> vector<8x4xf32>
    %193 = vector.extract_strided_slice %189 {offsets = [8, 0], sizes = [8, 8], strides = [1, 1]} : vector<16x8xf32> to vector<8x8xf32>
    %194 = vector.extract_strided_slice %6 {offsets = [8, 24], sizes = [8, 4], strides = [1, 1]} : vector<16x32xf32> to vector<8x4xf32>
    %cst_68 = arith.constant dense<0.000000e+00> : vector<8x4xf32>
    %195 = tpu.matmul %193, %194, %cst_68 {dimension_numbers = #tpu.dot_dimension_numbers<[1], [0], [0], [1], [0, 0, 1, 1], [], []>} : vector<8x8xf32>, vector<8x4xf32>, vector<8x4xf32> -> vector<8x4xf32>
    %196 = tpu.concatenate %192, %195 in 0 : vector<8x4xf32>, vector<8x4xf32> -> vector<16x4xf32>
    %197 = vector.extract_strided_slice %77 {offsets = [0, 56], sizes = [16, 8], strides = [1, 1]} : vector<16x64xf32> to vector<16x8xf32>
    %cst_69 = arith.constant dense<0xFF800000> : vector<16xf32>
    %198 = vector.multi_reduction <maximumf>, %197, %cst_69 [1] : vector<16x8xf32> to vector<16xf32>
    %199 = vector.shape_cast %198 : vector<16xf32> to vector<16x1xf32>
    %200 = vector.broadcast %199 : vector<16x1xf32> to vector<16x8xf32>
    %201 = arith.subf %197, %200 : vector<16x8xf32>
    %202 = math.exp %201 : vector<16x8xf32>
    %cst_70 = arith.constant dense<0.000000e+00> : vector<16xf32>
    %203 = vector.multi_reduction <add>, %202, %cst_70 [1] : vector<16x8xf32> to vector<16xf32>
    %204 = vector.shape_cast %203 : vector<16xf32> to vector<16x1xf32>
    %205 = vector.broadcast %204 : vector<16x1xf32> to vector<16x8xf32>
    %206 = arith.divf %202, %205 : vector<16x8xf32>
    %207 = vector.extract_strided_slice %206 {offsets = [0, 0], sizes = [8, 8], strides = [1, 1]} : vector<16x8xf32> to vector<8x8xf32>
    %208 = vector.extract_strided_slice %6 {offsets = [0, 28], sizes = [8, 4], strides = [1, 1]} : vector<16x32xf32> to vector<8x4xf32>
    %cst_71 = arith.constant dense<0.000000e+00> : vector<8x4xf32>
    %209 = tpu.matmul %207, %208, %cst_71 {dimension_numbers = #tpu.dot_dimension_numbers<[1], [0], [0], [1], [0, 0, 1, 1], [], []>} : vector<8x8xf32>, vector<8x4xf32>, vector<8x4xf32> -> vector<8x4xf32>
    %210 = vector.extract_strided_slice %206 {offsets = [8, 0], sizes = [8, 8], strides = [1, 1]} : vector<16x8xf32> to vector<8x8xf32>
    %211 = vector.extract_strided_slice %6 {offsets = [8, 28], sizes = [8, 4], strides = [1, 1]} : vector<16x32xf32> to vector<8x4xf32>
    %cst_72 = arith.constant dense<0.000000e+00> : vector<8x4xf32>
    %212 = tpu.matmul %210, %211, %cst_72 {dimension_numbers = #tpu.dot_dimension_numbers<[1], [0], [0], [1], [0, 0, 1, 1], [], []>} : vector<8x8xf32>, vector<8x4xf32>, vector<8x4xf32> -> vector<8x4xf32>
    %213 = tpu.concatenate %209, %212 in 0 : vector<8x4xf32>, vector<8x4xf32> -> vector<16x4xf32>
    %214 = tpu.concatenate %94, %111, %128, %145, %162, %179, %196, %213 in 1 : vector<16x4xf32>, vector<16x4xf32>, vector<16x4xf32>, vector<16x4xf32>, vector<16x4xf32>, vector<16x4xf32>, vector<16x4xf32>, vector<16x4xf32> -> vector<16x32xf32>
    %c0_73 = arith.constant 0 : index
    %c0_74 = arith.constant 0 : index
    %215 = vector.load %arg6[%c0_73, %c0_74] : memref<32x32xf32, #tpu.memory_space<vmem>>, vector<32x32xf32>
    %cst_75 = arith.constant dense<0.000000e+00> : vector<16x32xf32>
    %216 = tpu.matmul %214, %215, %cst_75 {dimension_numbers = #tpu.dot_dimension_numbers<[1], [0], [0], [1], [0, 0, 1, 1], [], []>} : vector<16x32xf32>, vector<32x32xf32>, vector<16x32xf32> -> vector<16x32xf32>
    %c0_76 = arith.constant 0 : index
    %c0_77 = arith.constant 0 : index
    %217 = vector.load %arg12[%c0_76, %c0_77] : memref<16x32xf32, #tpu.memory_space<vmem>>, vector<16x32xf32>
    tpu.vector_store %arg12[%c0_76, %c0_77], %216 {strides = array<i32>} : memref<16x32xf32, #tpu.memory_space<vmem>>, vector<16x32xf32>,
    return
  }
  func.func @transform_0(%arg0: i32) -> (i32, i32) {
    %c0_i32 = arith.constant 0 : i32
    %c0_i32_0 = arith.constant 0 : i32
    return %arg0, %c0_i32 : i32, i32
  }
  func.func @transform_1(%arg0: i32) -> (i32, i32) {
    %c0_i32 = arith.constant 0 : i32
    %c0_i32_0 = arith.constant 0 : i32
    return %arg0, %c0_i32 : i32, i32
  }
  func.func @transform_2(%arg0: i32) -> (i32, i32) {
    %c0_i32 = arith.constant 0 : i32
    %c0_i32_0 = arith.constant 0 : i32
    %c0_i32_1 = arith.constant 0 : i32
    return %c0_i32, %c0_i32_0 : i32, i32
  }
  func.func @transform_3(%arg0: i32) -> (i32, i32) {
    %c0_i32 = arith.constant 0 : i32
    %c0_i32_0 = arith.constant 0 : i32
    %c0_i32_1 = arith.constant 0 : i32
    return %c0_i32, %c0_i32_0 : i32, i32
  }
  func.func @transform_4(%arg0: i32) -> (i32, i32) {
    %c0_i32 = arith.constant 0 : i32
    %c0_i32_0 = arith.constant 0 : i32
    %c0_i32_1 = arith.constant 0 : i32
    return %c0_i32, %c0_i32_0 : i32, i32
  }
  func.func @transform_5(%arg0: i32) -> (i32, i32) {
    %c0_i32 = arith.constant 0 : i32
    %c0_i32_0 = arith.constant 0 : i32
    %c0_i32_1 = arith.constant 0 : i32
    return %c0_i32, %c0_i32_0 : i32, i32
  }
  func.func @transform_6(%arg0: i32) -> (i32, i32) {
    %c0_i32 = arith.constant 0 : i32
    %c0_i32_0 = arith.constant 0 : i32
    %c0_i32_1 = arith.constant 0 : i32
    return %c0_i32, %c0_i32_0 : i32, i32
  }
  func.func @transform_7(%arg0: i32) -> (i32, i32) {
    %c0_i32 = arith.constant 0 : i32
    %c0_i32_0 = arith.constant 0 : i32
    %c0_i32_1 = arith.constant 0 : i32
    return %c0_i32, %c0_i32_0 : i32, i32
  }
  func.func @transform_8(%arg0: i32) -> (i32, i32) {
    %c0_i32 = arith.constant 0 : i32
    %c0_i32_0 = arith.constant 0 : i32
    %c0_i32_1 = arith.constant 0 : i32
    return %c0_i32, %c0_i32_0 : i32, i32
  }
  func.func @transform_9(%arg0: i32) -> (i32, i32) {
    %c0_i32 = arith.constant 0 : i32
    %c0_i32_0 = arith.constant 0 : i32
    %c0_i32_1 = arith.constant 0 : i32
    return %c0_i32, %c0_i32_0 : i32, i32
  }
  func.func @transform_10(%arg0: i32) -> (i32, i32) {
    %c0_i32 = arith.constant 0 : i32
    %c0_i32_0 = arith.constant 0 : i32
    %c0_i32_1 = arith.constant 0 : i32
    return %c0_i32, %c0_i32_0 : i32, i32
  }
  func.func @transform_11(%arg0: i32) -> (i32, i32) {
    %c0_i32 = arith.constant 0 : i32
    %c0_i32_0 = arith.constant 0 : i32
    return %arg0, %c0_i32 : i32, i32
  }
}

</mosaic_0001>

<bundles_post_ra>
// kernel: tpu_custom_call.1
= control target key start
LH: loop header
LB: loop body
LE: loop exit
PB: predicated region body
PF: predicated region fallthrough
CT: control target
= control target key end

     0   :  { %16 = vsyncpa [#allocation3], 0  ;;  %s2963_s0 = inlined_call_operand.hbm [shape: f32[16,32], index: 0, kind: input, shape index: {}]   ;;  %s2964_s1 = inlined_call_operand.hbm [shape: f32[16,64], index: 1, kind: input, shape index: {}]   ;;  %s2965_s2 = inlined_call_operand.hbm [shape: f32[32,32], index: 2, kind: input, shape index: {}]   ;;  %s2966_s3 = inlined_call_operand.hbm [shape: f32[32,32], index: 3, kind: input, shape index: {}]   ;;  %s2967_s4 = inlined_call_operand.hbm [shape: f32[32,32], index: 4, kind: input, shape index: {}]   ;;  %s2968_s5 = inlined_call_operand.hbm [shape: f32[32,32], index: 5, kind: input, shape index: {}]   ;;  %s2969_s6 = inlined_call_operand.hbm [shape: f32[64,64], index: 6, kind: input, shape index: {}]   ;;  %s2970_s7 = inlined_call_operand.hbm [shape: f32[64,64], index: 7, kind: input, shape index: {}]   ;;  %s2971_s8 = inlined_call_operand.vmem [shape: f32[1,64], index: 8, kind: input, shape index: {}]   ;;  %s2972_s9 = inlined_call_operand.hbm [shape: f32[64,64], index: 9, kind: input, shape index: {}]   ;;  %s2973_s10 = inlined_call_operand.vmem [shape: f32[1,64], index: 10, kind: input, shape index: {}]   ;;  %s2974_s11 = inlined_call_operand.hbm [shape: f32[16,32], index: 11, kind: output, shape index: {}]  }
   0x1   :  { %17 = vsyncpa [#allocation6], 0 }
   0x2   :  { %18 = vsyncpa [#allocation9], 0 }
   0x3   :  { %19 = vsyncpa [#allocation12], 0 }
   0x4   :  { %20 = vsyncpa [#allocation15], 0 }
   0x5   :  { %21 = vsyncpa [#allocation4], 0  ;;  %s39_s19 = sshll.u32 %s2964_s1, 4  ;;  %s2372_s20 = smov [#allocation5]   ;;  %s40_s19 = int_to_ptr.hbm [resolvable:$true] %s39_s19 }
   0x6   :  { %s41_s21 = sshll.u32 %s2372_s20, 4  ;;  %s65_s24 = sshll.u32 %s2966_s3, 4  ;;  %s42_s21 = int_to_ptr.vmem [resolvable:$true] %s41_s21  ;;  %s66_s24 = int_to_ptr.hbm [resolvable:$true] %s65_s24 }
   0x7   :  { %s2373_s25 = smov 128   ;;  %s2374_s26 = smov 8  }
   0x8   :  { %47 = dma.hbm_to_vmem [thread:$0]  %s40_s19, 256, %s42_s21, [#allocation6], %s2373_s25, %s2373_s25, %s2374_s26  }
   0x9   :  { %s2375_s27 = smov [#allocation8]   ;;  %s91_s1 = sshll.u32 %s2968_s5, 4  ;;  %s92_s1 = int_to_ptr.hbm [resolvable:$true] %s91_s1 }
   0xa   :  { %s67_s28 = sshll.u32 %s2375_s27, 4  ;;  %s117_s13 = sshll.u32 %s2970_s7, 4  ;;  %s68_s28 = int_to_ptr.vmem [resolvable:$true] %s67_s28  ;;  %s118_s13 = int_to_ptr.hbm [resolvable:$true] %s117_s13 }
   0xb   :  { %73 = dma.hbm_to_vmem [thread:$0]  %s66_s24, 512, %s68_s28, [#allocation9], %s2373_s25, %s2373_s25, %s2374_s26  }
   0xc   :  { %s2376_s14 = smov [#allocation11]   ;;  %s2377_s16 = smov [#allocation14]  }
   0xd   :  { %s93_s15 = sshll.u32 %s2376_s14, 4  ;;  %s119_s5 = sshll.u32 %s2377_s16, 4  ;;  %s94_s15 = int_to_ptr.vmem [resolvable:$true] %s93_s15  ;;  %s120_s5 = int_to_ptr.vmem [resolvable:$true] %s119_s5 }
   0xe   :  { %99 = dma.hbm_to_vmem [thread:$0]  %s92_s1, 512, %s94_s15, [#allocation12], %s2373_s25, %s2373_s25, %s2374_s26  }
   0xf   :  { %s26_s19 = sshll.u32 %s2963_s0, 4  ;;  %s52_s21 = sshll.u32 %s2965_s2, 4  ;;  %s27_s19 = int_to_ptr.hbm [resolvable:$true] %s26_s19  ;;  %s53_s21 = int_to_ptr.hbm [resolvable:$true] %s52_s21 }
  0x10   :  { %125 = dma.hbm_to_vmem [thread:$0]  %s118_s13, 1024, %s120_s5, [#allocation15], %s2373_s25, %s2373_s25, %s2374_s26  }
  0x11   :  { %s2378_s22 = smov [#allocation2]   ;;  %s2379_s24 = smov [#allocation7]  }
  0x12   :  { %s28_s23 = sshll.u32 %s2378_s22, 4  ;;  %s54_s0 = sshll.u32 %s2379_s24, 4  ;;  %s29_s23 = int_to_ptr.vmem [resolvable:$true] %s28_s23  ;;  %s55_s0 = int_to_ptr.vmem [resolvable:$true] %s54_s0 }
  0x13   :  { %34 = dma.hbm_to_vmem [thread:$0]  %s27_s19, 256, %s29_s23, [#allocation3], %s2373_s25, %s2373_s25, %s2374_s26  }
  0x14   :  { %s78_s29 = sshll.u32 %s2967_s4, 4  ;;  %s104_s1 = sshll.u32 %s2969_s6, 4  ;;  %s79_s29 = int_to_ptr.hbm [resolvable:$true] %s78_s29  ;;  %s105_s1 = int_to_ptr.hbm [resolvable:$true] %s104_s1 }
  0x15   :  { %60 = dma.hbm_to_vmem [thread:$0]  %s53_s21, 512, %s55_s0, [#allocation6], %s2373_s25, %s2373_s25, %s2374_s26  }
  0x16   :  { %s2380_s3 = smov [#allocation10]   ;;  %s2381_s13 = smov [#allocation13]  }
  0x17   :  { %s80_s12 = sshll.u32 %s2380_s3, 4  ;;  %s106_s4 = sshll.u32 %s2381_s13, 4  ;;  %s81_s12 = int_to_ptr.vmem [resolvable:$true] %s80_s12  ;;  %s107_s4 = int_to_ptr.vmem [resolvable:$true] %s106_s4 }
  0x18   :  { %86 = dma.hbm_to_vmem [thread:$0]  %s79_s29, 512, %s81_s12, [#allocation9], %s2373_s25, %s2373_s25, %s2374_s26  }
  0x19   :  { %s132_s16 = sshll.u32 %s2972_s9, 4  ;;  %s2382_s6 = smov [#allocation16]   ;;  %s133_s16 = int_to_ptr.hbm [resolvable:$true] %s132_s16 }
  0x1a   :  { %112 = dma.hbm_to_vmem [thread:$0]  %s105_s1, 1024, %s107_s4, [#allocation12], %s2373_s25, %s2373_s25, %s2374_s26  }
  0x1b   :  { %s134_s5 = sshll.u32 %s2382_s6, 4  ;;  %s135_s5 = int_to_ptr.vmem [resolvable:$true] %s134_s5 }
  0x1c   :  { %140 = dma.hbm_to_vmem [thread:$0]  %s133_s16, 1024, %s135_s5, [#allocation15], %s2373_s25, %s2373_s25, %s2374_s26  }
  0x1d   :  { %2360 = dma.done.wait [#allocation3], 256  }
  0x1e   :  { %2361 = vsyncadd [#allocation3], 4294967040 }
  0x1f   :  { %2362 = dma.done.wait [#allocation6], 768  }
  0x20   :  { %2363 = vsyncadd [#allocation6], 4294966528 }
  0x21   :  { %2364 = dma.done.wait [#allocation9], 1024  }
  0x22   :  { %2365 = vsyncadd [#allocation9], 4294966272 }
  0x23   :  { %2366 = dma.done.wait [#allocation12], 1536  }
  0x24   :  { %2367 = vsyncadd [#allocation12], 4294965760 }
  0x25   :  { %2368 = dma.done.wait [#allocation15], 2048  }
  0x26   :  { %2369 = vsyncadd [#allocation15], 4294965248  ;;  %v218_v0 = vld [vmem:[#allocation8 + $0x18] sm:$0xff]  ;;  %v217_v1 = vld [vmem:[#allocation8 + $0x10] sm:$0xff]  ;;  %vm185_vm0 = vcmask 261120   ;;  %vm269_vm1 = vcmask 31744  }
  0x27   :  { %231 = vmatpush.msra.mxu1 %v218_v0  ;;  %v184_v2 = vld [vmem:[#allocation7 + $0x18] sm:$0xff]  ;;  %v216_v3 = vld [vmem:[#allocation8 + $0x8] sm:$0xff]  ;;  %v183_v4 = vld [vmem:[#allocation7 + $0x10] sm:$0xff]  ;;  %s2383_s9 = smov 108   ;;  %s2384_s17 = smov 120   ;;  %vm808_vm2 = vcmask 523264  }
  0x28   :  { %204 = vmatpush.msra.mxu0 %v184_v2  ;;  %v182_v5 = vld [vmem:[#allocation7 + $0x8] sm:$0xff]  ;;  %v215_v6 = vld [vmem:[#allocation8] sm:$0xff]  ;;  %s2385_s18 = smov 124   ;;  %s2386_s19 = smov 116   ;;  %v245_v16 = vld [vmem:[#allocation10 + $0x18] sm:$0xff]  ;;  %vm522_vm3 = vcmask 130048  }
  0x29   :  { %232 = vmatpush.msra.mxu1 %v217_v1  ;;  %v2519_v7 = vld [vmem:[#allocation2] sm:$0xff]  ;;  %v180_v9 = vld [vmem:[#allocation2 + $0x8] sm:$0xff]  ;;  %s2387_s7 = smov 104   ;;  %s2388_s20 = smov 112   ;;  %v244_v17 = vld [vmem:[#allocation10 + $0x10] sm:$0xff]  ;;  %258 = vmatpush.msra.mxu2 %v245_v16  ;;  %vm520_vm4 = vcmask 64512  }
  0x2a   :  { %205 = vmatpush.msra.mxu0 %v183_v4  ;;  %v181_v8 = vld [vmem:[#allocation7] sm:$0xff]  ;;  %s2389_s21 = smov 100   ;;  %v243_v18 = vld [vmem:[#allocation10 + $0x8] sm:$0xff]  ;;  %s2390_s22 = smov 24   ;;  %v797_v1 = vld [vmem:[#allocation13 + $0x38] sm:$0xff]  ;;  %vm524_vm5 = vcmask 195584  }
  0x2b   :  { %233 = vmatpush.msra.mxu1 %v216_v3  ;;  %259 = vmatpush.msra.mxu2 %v244_v17  ;;  %v242_v19 = vld [vmem:[#allocation10] sm:$0xff]  ;;  %s2391_s23 = smov 16   ;;  %s2392_s24 = smov 32   ;;  %v796_v2 = vld [vmem:[#allocation13 + $0x30] sm:$0xff]  ;;  %v795_v3 = vld [vmem:[#allocation13 + $0x28] sm:$0xff]  ;;  %vm527_vm6 = vcmask 326656  }
  0x2c   :  { %206 = vmatpush.msra.mxu0 %v182_v5  ;;  %s2393_s0 = smov 48   ;;  %s2394_s27 = smov 56   ;;  %v807_v4 = vld [vmem:[#allocation14 + $0x38] sm:$0xff]  ;;  %v794_v5 = vld [vmem:[#allocation13 + $0x20] sm:$0xff]  ;;  %vm529_vm7 = vcmask 392192   ;;  %vm531_vm8 = vcmask 457728  }
  0x2d   :  { %234 = vmatpush.msra.mxu1 %v215_v6  ;;  %260 = vmatpush.msra.mxu2 %v243_v18  ;;  %s2395_s28 = smov 40   ;;  %v806_v6 = vld [vmem:[#allocation14 + $0x30] sm:$0xff]  ;;  %v800_v16 = vld [vmem:[#allocation14] sm:$0xff]  ;;  %vm1010_vm9 = vcmask 130112   ;;  %vm1125_vm10 = vcmask 195712   ;;  %vm1238_vm11 = vcmask 261312  }
  0x2e   :  { %1936 = vmatmul.msk.f32.vlgmr.msra.gmra.mxu1 %vm185_vm0, %v2519_v7  ;;  %207 = vmatpush.msra.mxu0 %v181_v8  ;;  %v805_v8 = vld [vmem:[#allocation14 + $0x28] sm:$0xff]  ;;  %v798_v18 = vld [vmem:[#allocation5] sm:$0xff]  ;;  %vm1464_vm12 = vcmask 392512   ;;  %vm1351_vm13 = vcmask 326912   ;;  %vm1577_vm14 = vcmask 458112   ;;  %vm1690_vm15 = vcmask 523712  }
  0x2f   :  { %1934 = vmatmul.msk.f32.vlgmr.msra.gmra.mxu0 %vm185_vm0, %v2519_v7  ;;  %261 = vmatpush.msra.mxu2 %v242_v19  ;;  %s2398_s3 = smov 80   ;;  %s2399_s12 = smov 72  }
  0x30   :  { %1938 = vmatmul.msk.f32.vlgmr.msra.gmra.mxu2 %vm185_vm0, %v2519_v7  ;;  %v793_v7 = vld [vmem:[#allocation13 + $0x18] sm:$0xff]  ;;  %s2400_s13 = smov 4   ;;  %s2401_s4 = smov 12  }
  0x31   :  { %s2402_s14 = smov 20   ;;  %s2403_s15 = smov 28  }
  0x32   :  { %s2404_s16 = smov [#allocation17]  }
  0x33   :  { %s1915_s6 = sshll.u32 %s2404_s16, 4  ;;  %s1916_s6 = int_to_ptr.vmem [resolvable:$true] %s1915_s6 }
  0x36   :  { %1937 = vmatmul.msk.f32.gmra.mxu1 %vm185_vm0, %v180_v9 }
  0x37   :  { %1935 = vmatmul.msk.f32.gmra.mxu0 %vm185_vm0, %v180_v9 }
  0x38   :  { %1939 = vmatmul.msk.f32.gmra.mxu2 %vm185_vm0, %v180_v9  ;;  %v792_v9 = vld [vmem:[#allocation13 + $0x10] sm:$0xff] }
  0xab   :  { %v236_v10 = vpop.f32.mrf.mxu1 }
  0xac   :  { %410 = vrot.lane.b32.xlu2 %v236_v10, %s2383_s9  ;;  %326 = vrot.lane.b32.xlu1 %v236_v10, %s2384_s17  ;;  %v209_v11 = vpop.f32.mrf.mxu0 }
  0xad   :  { %298 = vrot.lane.b32.xlu0 %v236_v10, %s2385_s18  ;;  %1940 = vmatpush.xpose.msk.msra.mxu3 %vm269_vm1, %v236_v10 }
  0xb0   :  { %1941 = vmatmul.msk.f32.vlgmr.msra.gmra.mxu3 %vm269_vm1, %v209_v11 }
  0xb3   :  { %v239_v12 = vpop.f32.mrf.mxu1  ;;  %v2590_v46 = vpop.f32.mrf.mxu2 }
  0xb4   :  { %408 = vrot.lane.b32.xlu2 %v209_v11, %s2383_s9  ;;  %324 = vrot.lane.b32.xlu1 %v209_v11, %s2384_s17  ;;  %v212_v13 = vpop.f32.mrf.mxu0 }
  0xb5   :  { %296 = vrot.lane.b32.xlu0 %v209_v11, %s2385_s18 }
  0xbb   :  { %v2595_v48 = vpop.f32.mrf.mxu2 }
  0xbc   :  { %352 = vrot.lane.b32.xlu2 %v209_v11, %s2386_s19  ;;  %438 = vrot.lane.b32.xlu1 %v236_v10, %s2387_s7  ;;  %v2039_v63 = vpack.i.bf16 %v2595_v48, %v2590_v46 }
  0xbd   :  { %354 = vrot.lane.b32.xlu0 %v236_v10, %s2386_s19 }
  0xc4   :  { %380 = vrot.lane.b32.xlu2 %v209_v11, %s2388_s20  ;;  %382 = vrot.lane.b32.xlu1 %v236_v10, %s2388_s20 }
  0xc5   :  { %436 = vrot.lane.b32.xlu0 %v209_v11, %s2387_s7 }
  0xcc   :  { %589 = vrot.lane.b32.xlu2 %v239_v12, %s2384_s17  ;;  %561 = vrot.lane.b32.xlu1 %v239_v12, %s2385_s18 }
  0xcd   :  { %466 = vrot.lane.b32.xlu0 %v236_v10, %s2389_s21  ;;  %v804_v10 = vld [vmem:[#allocation14 + $0x20] sm:$0xff] }
  0xd4   :  { %587 = vrot.lane.b32.xlu2 %v212_v13, %s2384_s17  ;;  %559 = vrot.lane.b32.xlu1 %v212_v13, %s2385_s18 }
  0xd5   :  { %464 = vrot.lane.b32.xlu0 %v209_v11, %s2389_s21  ;;  %v791_v11 = vld [vmem:[#allocation13 + $0x8] sm:$0xff] }
  0xdc   :  { %701 = vrot.lane.b32.xlu2 %v239_v12, %s2387_s7  ;;  %673 = vrot.lane.b32.xlu1 %v239_v12, %s2383_s9 }
  0xdd   :  { %617 = vrot.lane.b32.xlu0 %v239_v12, %s2386_s19 }
  0xe4   :  { %699 = vrot.lane.b32.xlu2 %v212_v13, %s2387_s7  ;;  %671 = vrot.lane.b32.xlu1 %v212_v13, %s2383_s9 }
  0xe5   :  { %615 = vrot.lane.b32.xlu0 %v212_v13, %s2386_s19 }
  0xec   :  { %729 = vrot.lane.b32.xlu2 %v239_v12, %s2389_s21  ;;  %643 = vrot.lane.b32.xlu1 %v212_v13, %s2388_s20 }
  0xed   :  { %645 = vrot.lane.b32.xlu0 %v239_v12, %s2388_s20 }
  0xf5   :  { %727 = vrot.lane.b32.xlu0 %v212_v13, %s2389_s21 }
 0x106   :  { %v411_v14 = vpop.permute.xlu2 %410 }
 0x10e   :  { %v409_v15 = vpop.permute.xlu2 %408 }
 0x116   :  { %v353_v20 = vpop.permute.xlu2 %352 }
 0x11e   :  { %v327_v21 = vpop.permute.xlu1 %326  ;;  %v381_v22 = vpop.permute.xlu2 %380 }
 0x11f   :  { %v299_v23 = vpop.permute.xlu0 %298 }
 0x120   :  { %1942 = vmatpush.xpose.msk.msrb.mxu3 %vm269_vm1, %v299_v23  ;;  %v880_v23 = vld [vmem:[#allocation16 + $0x28] sm:$0xff] }
 0x124   :  { %1944 = vmatpush.xpose.msk.msra.mxu3 %vm269_vm1, %v327_v21  ;;  %v882_v21 = vld [vmem:[#allocation16 + $0x38] sm:$0xff] }
 0x126   :  { %v325_v24 = vpop.permute.xlu1 %324  ;;  %v590_v26 = vpop.permute.xlu2 %589 }
 0x127   :  { %v297_v25 = vpop.permute.xlu0 %296 }
 0x128   :  { %1943 = vmatmul.msk.f32.vlgmr.msrb.gmra.mxu3 %vm269_vm1, %v297_v25  ;;  %v879_v25 = vld [vmem:[#allocation16 + $0x20] sm:$0xff] }
 0x129   :  { %1950 = vmatpush.xpose.msk.msrb.mxu3 %vm269_vm1, %v411_v14  ;;  %v802_v14 = vld [vmem:[#allocation14 + $0x10] sm:$0xff] }
 0x12e   :  { %v439_v27 = vpop.permute.xlu1 %438  ;;  %v588_v29 = vpop.permute.xlu2 %587 }
 0x12f   :  { %v355_v28 = vpop.permute.xlu0 %354 }
 0x130   :  { %1945 = vmatmul.msk.f32.vlgmr.msra.gmra.mxu3 %vm269_vm1, %v325_v24  ;;  %1946 = vmatpush.xpose.msk.msrb.mxu0 %vm269_vm1, %v355_v28 }
 0x131   :  { %1952 = vmatpush.xpose.msk.msra.mxu3 %vm269_vm1, %v439_v27 }
 0x133   :  { %1947 = vmatmul.msk.f32.vlgmr.msrb.gmra.mxu0 %vm269_vm1, %v353_v20  ;;  %v2593_v47 = vpop.f32.mrf.mxu3 }
 0x136   :  { %v383_v30 = vpop.permute.xlu1 %382  ;;  %v702_v32 = vpop.permute.xlu2 %701 }
 0x137   :  { %v437_v31 = vpop.permute.xlu0 %436  ;;  %1948 = vmatpush.xpose.msk.msrb.mxu1 %vm269_vm1, %v383_v30 }
 0x138   :  { %1951 = vmatmul.msk.f32.vlgmr.msrb.gmra.mxu3 %vm269_vm1, %v409_v15  ;;  %v801_v15 = vld [vmem:[#allocation14 + $0x8] sm:$0xff] }
 0x139   :  { %1960 = vmatpush.xpose.msk.msrb.mxu3 %vm269_vm1, %v590_v26 }
 0x13a   :  { %1949 = vmatmul.msk.f32.vlgmr.msrb.gmra.mxu1 %vm269_vm1, %v381_v22  ;;  %v881_v22 = vld [vmem:[#allocation16 + $0x30] sm:$0xff] }
 0x13b   :  { %1956 = vmatpush.xpose.msk.msra.mxu1 %vm269_vm1, %v239_v12  ;;  %v803_v12 = vld [vmem:[#allocation14 + $0x18] sm:$0xff] }
 0x13e   :  { %v562_v33 = vpop.permute.xlu1 %561  ;;  %v700_v35 = vpop.permute.xlu2 %699 }
 0x13f   :  { %v467_v34 = vpop.permute.xlu0 %466  ;;  %1958 = vmatpush.xpose.msk.msrb.mxu2 %vm269_vm1, %v562_v33 }
 0x140   :  { %1953 = vmatmul.msk.f32.vlgmr.msra.gmra.mxu3 %vm269_vm1, %v437_v31  ;;  %1954 = vmatpush.xpose.msk.msra.mxu0 %vm269_vm1, %v467_v34  ;;  %v877_v31 = vld [vmem:[#allocation16 + $0x10] sm:$0xff]  ;;  %v876_v34 = vld [vmem:[#allocation16 + $0x8] sm:$0xff] }
 0x141   :  { %1968 = vmatpush.xpose.msk.msra.mxu3 %vm269_vm1, %v702_v32 }
 0x142   :  { %1957 = vmatmul.msk.f32.vlgmr.msra.gmra.mxu1 %vm269_vm1, %v212_v13  ;;  %v790_v13 = vld [vmem:[#allocation13] sm:$0xff] }
 0x146   :  { %v560_v36 = vpop.permute.xlu1 %559  ;;  %v730_v40 = vpop.permute.xlu2 %729 }
 0x147   :  { %v465_v37 = vpop.permute.xlu0 %464  ;;  %1959 = vmatmul.msk.f32.vlgmr.msrb.gmra.mxu2 %vm269_vm1, %v560_v36 }
 0x148   :  { %1955 = vmatmul.msk.f32.vlgmr.msra.gmra.mxu0 %vm269_vm1, %v465_v37  ;;  %1961 = vmatmul.msk.f32.vlgmr.msrb.gmra.mxu3 %vm269_vm1, %v588_v29  ;;  %v878_v29 = vld [vmem:[#allocation16 + $0x18] sm:$0xff] }
 0x149   :  { %901 = vmatpush.msrb.mxu3 %v882_v21  ;;  %v799_v37 = vld [vmem:[#allocation5 + $0x8] sm:$0xff] }
 0x14b   :  { %902 = vmatpush.msrb.mxu3 %v881_v22 }
 0x14d   :  { %903 = vmatpush.msrb.mxu3 %v880_v23 }
 0x14e   :  { %v674_v38 = vpop.permute.xlu1 %673 }
 0x14f   :  { %v618_v39 = vpop.permute.xlu0 %617  ;;  %1966 = vmatpush.xpose.msk.msra.mxu2 %vm269_vm1, %v674_v38  ;;  %904 = vmatpush.msrb.mxu3 %v879_v25  ;;  %v875_v38 = vld [vmem:[#allocation16] sm:$0xff] }
 0x150   :  { %1962 = vmatpush.xpose.msk.msrb.mxu0 %vm269_vm1, %v618_v39  ;;  %1969 = vmatmul.msk.f32.vlgmr.msra.gmra.mxu3 %vm269_vm1, %v700_v35 }
 0x151   :  { %905 = vmatpush.msrb.mxu3 %v878_v29 }
 0x153   :  { %852 = vmatpush.msrb.mxu2 %v797_v1  ;;  %906 = vmatpush.msrb.mxu3 %v877_v31 }
 0x154   :  { %1970 = vmatpush.xpose.msk.msra.mxu0 %vm269_vm1, %v730_v40 }
 0x155   :  { %853 = vmatpush.msrb.mxu2 %v796_v2  ;;  %907 = vmatpush.msrb.mxu3 %v876_v34 }
 0x156   :  { %v672_v41 = vpop.permute.xlu1 %671 }
 0x157   :  { %v616_v42 = vpop.permute.xlu0 %615  ;;  %1967 = vmatmul.msk.f32.vlgmr.msra.gmra.mxu2 %vm269_vm1, %v672_v41  ;;  %908 = vmatpush.msrb.mxu3 %v875_v38 }
 0x158   :  { %1963 = vmatmul.msk.f32.vlgmr.msrb.gmra.mxu0 %vm269_vm1, %v616_v42  ;;  %854 = vmatpush.msrb.mxu2 %v795_v3  ;;  %v2054_v3 = vld [vmem:[%s2971_s8] ss:$0 sm:$0xff]  ;;  %s2396_s8 = smov 96  }
 0x159   :  { %982 = vmatpush.msrb.mxu0 %v2590_v46 }
 0x15a   :  { %855 = vmatpush.msrb.mxu2 %v794_v5 }
 0x15c   :  { %856 = vmatpush.msrb.mxu2 %v793_v7 }
 0x15e   :  { %v644_v44 = vpop.permute.xlu1 %643  ;;  %857 = vmatpush.msrb.mxu2 %v792_v9 }
 0x15f   :  { %v646_v43 = vpop.permute.xlu0 %645 }
 0x160   :  { %1964 = vmatpush.xpose.msk.msrb.mxu1 %vm269_vm1, %v646_v43  ;;  %858 = vmatpush.msrb.mxu2 %v791_v11 }
 0x162   :  { %859 = vmatpush.msrb.mxu2 %v790_v13 }
 0x163   :  { %1965 = vmatmul.msk.f32.vlgmr.msrb.gmra.mxu1 %vm269_vm1, %v644_v44 }
 0x164   :  { %823 = vmatpush.msra.mxu1 %v807_v4 }
 0x166   :  { %824 = vmatpush.msra.mxu1 %v806_v6 }
 0x167   :  { %v728_v45 = vpop.permute.xlu0 %727 }
 0x168   :  { %1971 = vmatmul.msk.f32.vlgmr.msra.gmra.mxu0 %vm269_vm1, %v728_v45  ;;  %825 = vmatpush.msra.mxu1 %v805_v8 }
 0x169   :  { %1005 = vmatpush.msra.mxu0 %v2595_v48 }
 0x16a   :  { %826 = vmatpush.msra.mxu1 %v804_v10 }
 0x16c   :  { %827 = vmatpush.msra.mxu1 %v803_v12 }
 0x16e   :  { %828 = vmatpush.msra.mxu1 %v802_v14  ;;  %v2055_v14 = vld [vmem:[%s2973_s10] ss:$0 sm:$0xff]  ;;  %s2397_s10 = smov 88  }
 0x170   :  { %829 = vmatpush.msra.mxu1 %v801_v15 }
 0x172   :  { %830 = vmatpush.msra.mxu1 %v800_v16 }
 0x173   :  { %1972 = vmatmul.msk.f32.vlgmr.msra.gmra.mxu1 %vm808_vm2, %v798_v18 }
 0x17b   :  { %1973 = vmatmul.msk.f32.gmra.mxu1 %vm808_vm2, %v799_v37 }
 0x1ab   :  { %v321_v49 = vpop.f32.mrf.mxu3 }
 0x1b0   :  { %v377_v50 = vpop.f32.mrf.mxu0 }
 0x1b1   :  { %501 = vrot.lane.b32.xlu0 %v377_v50, %s2390_s22 }
 0x1b3   :  { %v349_v51 = vpop.f32.mrf.mxu3 }
 0x1b4   :  { %497 = vrot.lane.b32.xlu2 %v349_v51, %s2391_s23 }
 0x1b7   :  { %v405_v52 = vpop.f32.mrf.mxu1 }
 0x1b8   :  { %505 = vrot.lane.b32.xlu1 %v405_v52, %s2392_s24 }
 0x1bb   :  { %v433_v53 = vpop.f32.mrf.mxu3 }
 0x1bf   :  { %v2604_v59 = vpop.f32.mrf.mxu1 }
 0x1c0   :  { %493 = vrot.lane.b32.xlu1 %v321_v49, %s2374_s26 }
 0x1c3   :  { %v461_v54 = vpop.f32.mrf.mxu3 }
 0x1c4   :  { %513 = vrot.lane.b32.xlu0 %v461_v54, %s2393_s0 }
 0x1c5   :  { %v489_v55 = vpop.f32.mrf.mxu0 }
 0x1c8   :  { %517 = vrot.lane.b32.xlu1 %v489_v55, %s2394_s27 }
 0x1ca   :  { %v584_v56 = vpop.f32.mrf.mxu2 }
 0x1cb   :  { %v612_v57 = vpop.f32.mrf.mxu3  ;;  %756 = vrot.lane.b32.xlu2 %v584_v56, %s2374_s26 }
 0x1cc   :  { %760 = vrot.lane.b32.xlu0 %v612_v57, %s2391_s23 }
 0x1d3   :  { %509 = vrot.lane.b32.xlu2 %v433_v53, %s2395_s28  ;;  %v724_v61 = vpop.f32.mrf.mxu3 }
 0x1d5   :  { %v640_v58 = vpop.f32.mrf.mxu0 }
 0x1d6   :  { %764 = vrot.lane.b32.xlu1 %v640_v58, %s2390_s22 }
 0x1da   :  { %v696_v60 = vpop.f32.mrf.mxu2 }
 0x1db   :  { %772 = vrot.lane.b32.xlu0 %v696_v60, %s2395_s28 }
 0x1de   :  { %776 = vrot.lane.b32.xlu1 %v724_v61, %s2393_s0 }
 0x1e0   :  { %v668_v62 = vpop.f32.mrf.mxu1 }
 0x1e1   :  { %768 = vrot.lane.b32.xlu2 %v668_v62, %s2392_s24 }
 0x1e3   :  { %2040 = vrot.lane.b32.xlu0 %v2039_v63, %s2386_s19 }
 0x1e5   :  { %v752_v0 = vpop.f32.mrf.mxu0 }
 0x1e6   :  { %2035 = vrot.lane.b32.xlu1 %v2039_v63, %s2384_s17 }
 0x1e9   :  { %780 = vrot.lane.b32.xlu2 %v752_v0, %s2394_s27 }
 0x1eb   :  { %2045 = vrot.lane.b32.xlu0 %v2039_v63, %s2388_s20 }
 0x1f0   :  { %v832_v2 = vpop.f32.mrf.mxu1 }
 0x1f1   :  { %2030 = vrot.lane.b32.xlu2 %v2039_v63, %s2385_s18 }
 0x1f3   :  { %2050 = vrot.lane.b32.xlu0 %v2039_v63, %s2383_s9 }
 0x1f8   :  { %v835_v9 = vpop.f32.mrf.mxu1 }
 0x20e   :  { %v498_v17 = vpop.permute.xlu2 %497 }
 0x223   :  { %v502_v24 = vpop.permute.xlu0 %501 }
 0x225   :  { %v757_v19 = vpop.permute.xlu2 %756 }
 0x226   :  { %v783_v45 = vsel %vm520_vm4, %v2604_v59, %v757_v19 }
 0x22a   :  { %v506_v20 = vpop.permute.xlu1 %505 }
 0x22d   :  { %v510_v27 = vpop.permute.xlu2 %509 }
 0x232   :  { %v494_v26 = vpop.permute.xlu1 %493 }
 0x233   :  { %v521_v28 = vsel %vm520_vm4, %v2593_v47, %v494_v26 }
 0x234   :  { %v523_v30 = vsel %vm522_vm3, %v521_v28, %v498_v17 }
 0x235   :  { %v525_v32 = vsel %vm524_vm5, %v523_v30, %v502_v24 }
 0x236   :  { %v526_v33 = vsel %vm185_vm0, %v525_v32, %v506_v20  ;;  %v514_v36 = vpop.permute.xlu0 %513 }
 0x237   :  { %v528_v35 = vsel %vm527_vm6, %v526_v33, %v510_v27 }
 0x238   :  { %v530_v39 = vsel %vm529_vm7, %v528_v35, %v514_v36 }
 0x23a   :  { %v518_v40 = vpop.permute.xlu1 %517 }
 0x23b   :  { %v769_v41 = vpop.permute.xlu2 %768  ;;  %v532_v42 = vsel %vm531_vm8, %v530_v39, %v518_v40 }
 0x23c   :  { %1974 = vmatmul.msk.f32.vlgmr.msrb.gmra.mxu2 %vm808_vm2, %v532_v42 }
 0x23e   :  { %v761_v44 = vpop.permute.xlu0 %760 }
 0x23f   :  { %v784_v49 = vsel %vm522_vm3, %v783_v45, %v761_v44 }
 0x243   :  { %v781_v43 = vpop.permute.xlu2 %780 }
 0x248   :  { %v765_v47 = vpop.permute.xlu1 %764 }
 0x249   :  { %v785_v50 = vsel %vm524_vm5, %v784_v49, %v765_v47 }
 0x24a   :  { %v786_v54 = vsel %vm185_vm0, %v785_v50, %v769_v41 }
 0x24b   :  { %v2628_v51 = vpop.permute.xlu2 %2030 }
 0x24c   :  { %v2033_v52 = vunpack.i.h.bf16 %v2628_v51 }
 0x24d   :  { %v773_v53 = vpop.permute.xlu0 %772 }
 0x24e   :  { %v787_v55 = vsel %vm527_vm6, %v786_v54, %v773_v53  ;;  %1120 = vmatpush.msrb.mxu1 %v2033_v52 }
 0x250   :  { %v777_v56 = vpop.permute.xlu1 %776 }
 0x251   :  { %v788_v57 = vsel %vm529_vm7, %v787_v55, %v777_v56 }
 0x252   :  { %v789_v58 = vsel %vm531_vm8, %v788_v57, %v781_v43 }
 0x253   :  { %1975 = vmatmul.msk.f32.gmra.mxu2 %vm808_vm2, %v789_v58 }
 0x255   :  { %v2636_v59 = vpop.permute.xlu0 %2040 }
 0x256   :  { %v2043_v60 = vunpack.i.h.bf16 %v2636_v59 }
 0x258   :  { %v2036_v61 = vpop.permute.xlu1 %2035  ;;  %1346 = vmatpush.msra.mxu1 %v2043_v60 }
 0x259   :  { %v2038_v62 = vunpack.i.h.bf16 %v2036_v61  ;;  %v2037_v63 = vunpack.i.l.bf16 %v2036_v61 }
 0x25b   :  { %1205 = vmatpush.msra.mxu2 %v2037_v63  ;;  %1233 = vmatpush.msra.mxu3 %v2038_v62 }
 0x25d   :  { %v2046_v0 = vpop.permute.xlu0 %2045 }
 0x25e   :  { %v2047_v1 = vunpack.i.l.bf16 %v2046_v0  ;;  %v2048_v8 = vunpack.i.h.bf16 %v2046_v0 }
 0x260   :  { %1431 = vmatpush.msrb.mxu2 %v2047_v1 }
 0x265   :  { %v2683_v35 = vpop.permute.xlu0 %2050 }
 0x2bf   :  { %v861_v4 = vpop.f32.mrf.mxu2 }
 0x2c0   :  { %v862_v5 = vadd.f32 %v861_v4, %v832_v2 }
 0x2c2   :  { %v871_v6 = vadd.f32 %v2054_v3, %v862_v5 }
 0x2c4   :  { %v873_v7 = vmax.f32 %v871_v6, 0.0 }
 0x2c6   :  { %1976 = vmatmul.msk.f32.vlgmr.msrb.gmra.mxu3 %vm808_vm2, %v873_v7 }
 0x2c7   :  { %1459 = vmatpush.msrb.mxu3 %v2048_v8 }
 0x2d6   :  { %v864_v10 = vpop.f32.mrf.mxu2 }
 0x2d7   :  { %v865_v11 = vadd.f32 %v864_v10, %v835_v9 }
 0x2d9   :  { %v872_v12 = vadd.f32 %v2054_v3, %v865_v11 }
 0x2db   :  { %v874_v13 = vmax.f32 %v872_v12, 0.0 }
 0x2dd   :  { %1977 = vmatmul.msk.f32.gmra.mxu3 %vm808_vm2, %v874_v13 }
 0x349   :  { %v910_v15 = vpop.f32.mrf.mxu3 }
 0x34a   :  { %v2647_v16 = vadd.f32 %v2055_v14, %v910_v15 }
 0x34c   :  { %v1011_v17 = vsel %vm1010_vm9, %v2647_v16, -inf  ;;  %v1126_v18 = vsel %vm1125_vm10, %v2647_v16, -inf  ;;  %v1239_v19 = vsel %vm1238_vm11, %v2647_v16, -inf  ;;  %v1465_v20 = vsel %vm1464_vm12, %v2647_v16, -inf }
 0x34d   :  { %1012 = vmax.xlane.f32.xlu0 %v1011_v17  ;;  %1127 = vmax.xlane.f32.xlu1 %v1126_v18  ;;  %v1352_v21 = vsel %vm1351_vm13, %v2647_v16, -inf  ;;  %v1578_v22 = vsel %vm1577_vm14, %v2647_v16, -inf  ;;  %v1691_v23 = vsel %vm1690_vm15, %v2647_v16, -inf  ;;  %v916_v28 = vsel %vm520_vm4, %v2647_v16, -inf }
 0x34e   :  { %1240 = vmax.xlane.f32.xlu2 %v1239_v19 }
 0x355   :  { %1466 = vmax.xlane.f32.xlu0 %v1465_v20  ;;  %1353 = vmax.xlane.f32.xlu1 %v1352_v21 }
 0x356   :  { %1579 = vmax.xlane.f32.xlu2 %v1578_v22 }
 0x35d   :  { %1692 = vmax.xlane.f32.xlu1 %v1691_v23 }
 0x360   :  { %v913_v24 = vpop.f32.mrf.mxu3 }
 0x361   :  { %v2663_v25 = vadd.f32 %v2055_v14, %v913_v24 }
 0x363   :  { %v1129_v26 = vsel %vm1125_vm10, %v2663_v25, -inf  ;;  %v1014_v27 = vsel %vm1010_vm9, %v2663_v25, -inf  ;;  %v1468_v29 = vsel %vm1464_vm12, %v2663_v25, -inf  ;;  %v1242_v30 = vsel %vm1238_vm11, %v2663_v25, -inf }
 0x364   :  { %1130 = vmax.xlane.f32.xlu0 %v1129_v26  ;;  %1015 = vmax.xlane.f32.xlu2 %v1014_v27  ;;  %v1355_v31 = vsel %vm1351_vm13, %v2663_v25, -inf  ;;  %v1694_v32 = vsel %vm1690_vm15, %v2663_v25, -inf  ;;  %v1581_v33 = vsel %vm1577_vm14, %v2663_v25, -inf  ;;  %v919_v34 = vsel %vm520_vm4, %v2663_v25, -inf }
 0x365   :  { %917 = vmax.xlane.f32.xlu1 %v916_v28 }
 0x36c   :  { %1469 = vmax.xlane.f32.xlu0 %v1468_v29  ;;  %1243 = vmax.xlane.f32.xlu2 %v1242_v30 }
 0x36d   :  { %1356 = vmax.xlane.f32.xlu1 %v1355_v31 }
 0x374   :  { %1695 = vmax.xlane.f32.xlu0 %v1694_v32  ;;  %1582 = vmax.xlane.f32.xlu2 %v1581_v33 }
 0x37c   :  { %920 = vmax.xlane.f32.xlu0 %v919_v34 }
 0x3c0   :  { %v1013_v36 = vpop.xlane.xlu0 %1012  ;;  %v1128_v37 = vpop.xlane.xlu1 %1127 }
 0x3c1   :  { %v1017_v38 = vsub.f32 %v2647_v16, %v1013_v36  ;;  %v1132_v39 = vsub.f32 %v2647_v16, %v1128_v37  ;;  %v1241_v40 = vpop.xlane.xlu2 %1240 }
 0x3c2   :  { %v1245_v43 = vsub.f32 %v2647_v16, %v1241_v40 }
 0x3c3   :  { %v1019_v41 = vmul.f32 1.442695, %v1017_v38  ;;  %v1134_v42 = vmul.f32 1.442695, %v1132_v39 }
 0x3c4   :  { %v1247_v45 = vmul.f32 1.442695, %v1245_v43 }
 0x3c5   :  { %2056 = vpow2.f32 %v1019_v41 }
 0x3c6   :  { %2058 = vpow2.f32 %v1134_v42 }
 0x3c7   :  { %2060 = vpow2.f32 %v1247_v45 }
 0x3c8   :  { %v1354_v44 = vpop.xlane.xlu1 %1353  ;;  %v1467_v50 = vpop.xlane.xlu0 %1466 }
 0x3c9   :  { %v1358_v47 = vsub.f32 %v2647_v16, %v1354_v44  ;;  %v1471_v54 = vsub.f32 %v2647_v16, %v1467_v50  ;;  %v1580_v55 = vpop.xlane.xlu2 %1579 }
 0x3ca   :  { %v1584_v60 = vsub.f32 %v2647_v16, %v1580_v55 }
 0x3cb   :  { %v2689_v49 = vpop.eup %2056  ;;  %v1360_v52 = vmul.f32 1.442695, %v1358_v47  ;;  %v1473_v56 = vmul.f32 1.442695, %v1471_v54 }
 0x3cc   :  { %v2691_v53 = vpop.eup %2058  ;;  %1025 = vrot.lane.b32.xlu1 %v2689_v49, %s2384_s17  ;;  %v1586_v1 = vmul.f32 1.442695, %v1584_v60 }
 0x3cd   :  { %1140 = vrot.lane.b32.xlu2 %v2691_v53, %s2388_s20  ;;  %2062 = vpow2.f32 %v1360_v52  ;;  %v2698_v57 = vpop.eup %2060 }
 0x3ce   :  { %2064 = vpow2.f32 %v1473_v56 }
 0x3d0   :  { %v1693_v61 = vpop.xlane.xlu1 %1692 }
 0x3d1   :  { %v1697_v5 = vsub.f32 %v2647_v16, %v1693_v61 }
 0x3d3   :  { %v2700_v58 = vpop.eup %2062  ;;  %v1699_v9 = vmul.f32 1.442695, %v1697_v5 }
 0x3d4   :  { %1253 = vrot.lane.b32.xlu1 %v2698_v57, %s2387_s7  ;;  %v2708_v3 = vpop.eup %2064 }
 0x3d5   :  { %1366 = vrot.lane.b32.xlu2 %v2700_v58, %s2396_s8 }
 0x3d7   :  { %v1131_v62 = vpop.xlane.xlu0 %1130  ;;  %v1016_v63 = vpop.xlane.xlu2 %1015 }
 0x3d8   :  { %v1018_v0 = vsub.f32 %v2663_v25, %v1016_v63  ;;  %v1133_v4 = vsub.f32 %v2663_v25, %v1131_v62  ;;  %v918_v7 = vpop.xlane.xlu1 %917 }
 0x3d9   :  { %v922_v28 = vsub.f32 %v2647_v16, %v918_v7 }
 0x3da   :  { %v1021_v2 = vmul.f32 1.442695, %v1018_v0  ;;  %v1136_v8 = vmul.f32 1.442695, %v1133_v4 }
 0x3db   :  { %v924_v29 = vmul.f32 1.442695, %v922_v28 }
 0x3dc   :  { %2066 = vpow2.f32 %v1021_v2 }
 0x3dd   :  { %1479 = vrot.lane.b32.xlu2 %v2708_v3, %s2397_s10  ;;  %2068 = vpow2.f32 %v1586_v1 }
 0x3de   :  { %2070 = vpow2.f32 %v1136_v8 }
 0x3df   :  { %v1470_v6 = vpop.xlane.xlu0 %1469  ;;  %v1244_v10 = vpop.xlane.xlu2 %1243  ;;  %2072 = vpow2.f32 %v1699_v9 }
 0x3e0   :  { %v1246_v13 = vsub.f32 %v2663_v25, %v1244_v10  ;;  %v1357_v18 = vpop.xlane.xlu1 %1356  ;;  %v1472_v36 = vsub.f32 %v2663_v25, %v1470_v6 }
 0x3e1   :  { %v1359_v22 = vsub.f32 %v2663_v25, %v1357_v18 }
 0x3e2   :  { %v2714_v11 = vpop.eup %2066  ;;  %v1249_v17 = vmul.f32 1.442695, %v1246_v13  ;;  %v1475_v39 = vmul.f32 1.442695, %v1472_v36 }
 0x3e3   :  { %v2716_v12 = vpop.eup %2068  ;;  %1027 = vrot.lane.b32.xlu0 %v2714_v11, %s2384_s17  ;;  %v1362_v23 = vmul.f32 1.442695, %v1359_v22 }
 0x3e4   :  { %v2724_v20 = vpop.eup %2070 }
 0x3e5   :  { %1592 = vrot.lane.b32.xlu2 %v2716_v12, %s2398_s3  ;;  %v2726_v21 = vpop.eup %2072 }
 0x3e7   :  { %v1696_v14 = vpop.xlane.xlu0 %1695  ;;  %v1583_v37 = vpop.xlane.xlu2 %1582 }
 0x3e8   :  { %v1698_v15 = vsub.f32 %v2663_v25, %v1696_v14  ;;  %v1585_v40 = vsub.f32 %v2663_v25, %v1583_v37 }
 0x3ea   :  { %v1701_v19 = vmul.f32 1.442695, %v1698_v15  ;;  %v1588_v42 = vmul.f32 1.442695, %v1585_v40  ;;  %v2032_v40 = vunpack.i.l.bf16 %v2628_v51 }
 0x3eb   :  { %1142 = vrot.lane.b32.xlu0 %v2724_v20, %s2388_s20 }
 0x3ec   :  { %2074 = vpow2.f32 %v1701_v19 }
 0x3ed   :  { %2076 = vpow2.f32 %v1249_v17  ;;  %1705 = vrot.lane.b32.xlu2 %v2726_v21, %s2399_s12 }
 0x3ee   :  { %2078 = vpow2.f32 %v1362_v23 }
 0x3ef   :  { %2080 = vpow2.f32 %v924_v29  ;;  %v921_v30 = vpop.xlane.xlu0 %920 }
 0x3f0   :  { %v923_v32 = vsub.f32 %v2663_v25, %v921_v30 }
 0x3f2   :  { %v2733_v24 = vpop.eup %2074  ;;  %v926_v34 = vmul.f32 1.442695, %v923_v32 }
 0x3f3   :  { %v2735_v26 = vpop.eup %2076  ;;  %1707 = vrot.lane.b32.xlu1 %v2733_v24, %s2399_s12 }
 0x3f4   :  { %1255 = vrot.lane.b32.xlu0 %v2735_v26, %s2387_s7  ;;  %v2741_v27 = vpop.eup %2078  ;;  %2082 = vpow2.f32 %v926_v34 }
 0x3f5   :  { %v2746_v31 = vpop.eup %2080  ;;  %2084 = vpow2.f32 %v1475_v39 }
 0x3f6   :  { %v928_v33 = vsel %vm520_vm4, %v2746_v31, 0.0  ;;  %2086 = vpow2.f32 %v1588_v42 }
 0x3fa   :  { %v2752_v38 = vpop.eup %2082 }
 0x3fb   :  { %v931_v16 = vsel %vm520_vm4, %v2752_v38, 0.0  ;;  %v2757_v43 = vpop.eup %2084 }
 0x3fc   :  { %1368 = vrot.lane.b32.xlu0 %v2741_v27, %s2396_s8  ;;  %v2762_v47 = vpop.eup %2086 }
 0x416   :  { %929 = vadd.xlane.f32.xlu2 %v928_v33 }
 0x426   :  { %932 = vadd.xlane.f32.xlu0 %v931_v16 }
 0x427   :  { %v1141_v41 = vpop.permute.xlu2 %1140 }
 0x428   :  { %v1146_v44 = vsel %vm520_vm4, %v1141_v41, 0.0 }
 0x42e   :  { %1147 = vadd.xlane.f32.xlu0 %v1146_v44  ;;  %1481 = vrot.lane.b32.xlu2 %v2757_v43, %s2397_s10 }
 0x42f   :  { %v1367_v45 = vpop.permute.xlu2 %1366 }
 0x430   :  { %v1372_v61 = vsel %vm520_vm4, %v1367_v45, 0.0 }
 0x436   :  { %1594 = vrot.lane.b32.xlu2 %v2762_v47, %s2398_s3 }
 0x437   :  { %v1480_v50 = vpop.permute.xlu2 %1479 }
 0x438   :  { %v1485_v0 = vsel %vm520_vm4, %v1480_v50, 0.0 }
 0x43e   :  { %v1026_v52 = vpop.permute.xlu1 %1025 }
 0x43f   :  { %v1593_v25 = vpop.permute.xlu2 %1592  ;;  %v1031_v2 = vsel %vm520_vm4, %v1026_v52, 0.0 }
 0x440   :  { %v1598_v4 = vsel %vm520_vm4, %v1593_v25, 0.0 }
 0x446   :  { %v1254_v54 = vpop.permute.xlu1 %1253 }
 0x447   :  { %v1706_v55 = vpop.permute.xlu2 %1705  ;;  %v1259_v56 = vsel %vm520_vm4, %v1254_v54, 0.0 }
 0x448   :  { %1260 = vadd.xlane.f32.xlu0 %v1259_v56  ;;  %v1711_v60 = vsel %vm520_vm4, %v1706_v55, 0.0 }
 0x449   :  { %1712 = vadd.xlane.f32.xlu1 %v1711_v60 }
 0x450   :  { %1373 = vadd.xlane.f32.xlu0 %v1372_v61 }
 0x455   :  { %v1028_v62 = vpop.permute.xlu0 %1027 }
 0x456   :  { %v1034_v63 = vsel %vm520_vm4, %v1028_v62, 0.0 }
 0x457   :  { %1035 = vadd.xlane.f32.xlu1 %v1034_v63  ;;  %v2042_v63 = vunpack.i.l.bf16 %v2636_v59 }
 0x458   :  { %1486 = vadd.xlane.f32.xlu0 %v1485_v0 }
 0x45d   :  { %v1143_v1 = vpop.permute.xlu0 %1142 }
 0x45e   :  { %v1149_v9 = vsel %vm520_vm4, %v1143_v1, 0.0 }
 0x45f   :  { %1032 = vadd.xlane.f32.xlu2 %v1031_v2 }
 0x460   :  { %1599 = vadd.xlane.f32.xlu0 %v1598_v4 }
 0x465   :  { %v1708_v5 = vpop.permute.xlu1 %1707 }
 0x466   :  { %v1256_v6 = vpop.permute.xlu0 %1255  ;;  %v1714_v7 = vsel %vm520_vm4, %v1708_v5, 0.0 }
 0x467   :  { %v1262_v8 = vsel %vm520_vm4, %v1256_v6, 0.0  ;;  %1715 = vadd.xlane.f32.xlu1 %v1714_v7 }
 0x468   :  { %1263 = vadd.xlane.f32.xlu2 %v1262_v8  ;;  %1150 = vadd.xlane.f32.xlu0 %v1149_v9 }
 0x46e   :  { %v1369_v10 = vpop.permute.xlu0 %1368 }
 0x46f   :  { %v1375_v13 = vsel %vm520_vm4, %v1369_v10, 0.0 }
 0x470   :  { %1376 = vadd.xlane.f32.xlu2 %v1375_v13 }
 0x489   :  { %v930_v14 = vpop.xlane.xlu2 %929 }
 0x48a   :  { %2088 = vrcp.f32 %v930_v14  ;;  %v945_v23 = vand.u32 2147483648, %v930_v14  ;;  %v943_v29 = vand.u32 2147483647, %v930_v14  ;;  %vm939_vm6 = vweird.f32 %v930_v14 }
 0x48c   :  { %v946_v32 = vor.u32 1.1754944e-38, %v945_v23  ;;  %vm944_vm8 = vcmp.eq.f32.partialorder %v943_v29, 8.507059e+37 }
 0x490   :  { %v2089_v15 = vpop.eup %2088 }
 0x491   :  { %v935_v17 = vmul.f32 %v2089_v15, %v930_v14  ;;  %v1482_v18 = vpop.permute.xlu2 %1481  ;;  %vm940_vm2 = vweird.f32 %v2089_v15 }
 0x492   :  { %v1488_v19 = vsel %vm520_vm4, %v1482_v18, 0.0  ;;  %vm941_vm7 = vmor %vm939_vm6, %vm940_vm2 }
 0x493   :  { %v936_v22 = vsub.f32 1.0, %v935_v17  ;;  %1489 = vadd.xlane.f32.xlu0 %v1488_v19 }
 0x495   :  { %v937_v28 = vmul.f32 %v2089_v15, %v936_v22 }
 0x497   :  { %v938_v30 = vadd.f32 %v2089_v15, %v937_v28 }
 0x499   :  { %v942_v33 = vsel %vm941_vm7, %v2089_v15, %v938_v30  ;;  %v933_v34 = vpop.xlane.xlu0 %932  ;;  %v1595_v36 = vpop.permute.xlu2 %1594 }
 0x49a   :  { %v947_v37 = vsel %vm944_vm8, %v946_v32, %v942_v33  ;;  %2090 = vrcp.f32 %v933_v34  ;;  %v1601_v39 = vsel %vm520_vm4, %v1595_v36, 0.0  ;;  %v960_v50 = vand.u32 2147483648, %v933_v34 }
 0x49b   :  { %v948_v16 = vmul.f32 %v2746_v31, %v947_v37  ;;  %1602 = vadd.xlane.f32.xlu2 %v1601_v39  ;;  %v958_v25 = vand.u32 2147483647, %v933_v34  ;;  %vm954_vm10 = vweird.f32 %v933_v34 }
 0x49c   :  { %v961_v31 = vor.u32 1.1754944e-38, %v960_v50 }
 0x49d   :  { %1978 = vmatmul.msk.f32.vlgmr.msrb.gmra.mxu0 %vm520_vm4, %v948_v16  ;;  %vm959_vm12 = vcmp.eq.f32.partialorder %v958_v25, 8.507059e+37 }
 0x49e   :  { %1091 = vmatpush.msrb.mxu0 %v2032_v40 }
 0x4a0   :  { %v2091_v41 = vpop.eup %2090 }
 0x4a1   :  { %v950_v42 = vmul.f32 %v2091_v41, %v933_v34  ;;  %v1148_v44 = vpop.xlane.xlu0 %1147  ;;  %vm955_vm9 = vweird.f32 %v2091_v41 }
 0x4a2   :  { %2092 = vrcp.f32 %v1148_v44  ;;  %vm956_vm11 = vmor %vm954_vm10, %vm955_vm9  ;;  %v1163_v0 = vand.u32 2147483648, %v1148_v44  ;;  %v1161_v2 = vand.u32 2147483647, %v1148_v44  ;;  %vm1157_vm14 = vweird.f32 %v1148_v44 }
 0x4a3   :  { %v951_v45 = vsub.f32 1.0, %v950_v42 }
 0x4a4   :  { %v1164_v5 = vor.u32 1.1754944e-38, %v1163_v0  ;;  %vm1162_vm2 = vcmp.eq.f32.partialorder %v1161_v2, 8.507059e+37 }
 0x4a5   :  { %v952_v52 = vmul.f32 %v2091_v41, %v951_v45 }
 0x4a7   :  { %v953_v54 = vadd.f32 %v2091_v41, %v952_v52 }
 0x4a8   :  { %v2093_v55 = vpop.eup %2092 }
 0x4a9   :  { %v957_v56 = vsel %vm956_vm11, %v2091_v41, %v953_v54  ;;  %v1153_v51 = vmul.f32 %v2093_v55, %v1148_v44  ;;  %vm1158_vm13 = vweird.f32 %v2093_v55 }
 0x4aa   :  { %v962_v60 = vsel %vm959_vm12, %v961_v31, %v957_v56  ;;  %vm1159_vm15 = vmor %vm1157_vm14, %vm1158_vm13 }
 0x4ab   :  { %v1154_v61 = vsub.f32 1.0, %v1153_v51  ;;  %v963_v62 = vmul.f32 %v2752_v38, %v962_v60 }
 0x4ad   :  { %v1155_v1 = vmul.f32 %v2093_v55, %v1154_v61  ;;  %1979 = vmatmul.msk.f32.vlgmr.msra.gmra.mxu0 %vm520_vm4, %v963_v62 }
 0x4ae   :  { %1318 = vmatpush.msra.mxu0 %v2042_v63 }
 0x4af   :  { %v1156_v4 = vadd.f32 %v2093_v55, %v1155_v1 }
 0x4b1   :  { %v1160_v6 = vsel %vm1159_vm15, %v2093_v55, %v1156_v4 }
 0x4b2   :  { %v1165_v7 = vsel %vm1162_vm2, %v1164_v5, %v1160_v6 }
 0x4b3   :  { %v1166_v8 = vmul.f32 %v2691_v53, %v1165_v7 }
 0x4b5   :  { %1183 = vrot.lane.b32.xlu2 %v1166_v8, %s2388_s20 }
 0x4bb   :  { %v1261_v38 = vpop.xlane.xlu0 %1260 }
 0x4bc   :  { %2094 = vrcp.f32 %v1261_v38  ;;  %v2787_v10 = vpop.xlane.xlu1 %1712  ;;  %v1276_v17 = vand.u32 2147483648, %v1261_v38  ;;  %v1274_v18 = vand.u32 2147483647, %v1261_v38  ;;  %vm1270_vm7 = vweird.f32 %v1261_v38 }
 0x4be   :  { %v1277_v53 = vor.u32 1.1754944e-38, %v1276_v17  ;;  %vm1275_vm9 = vcmp.eq.f32.partialorder %v1274_v18, 8.507059e+37 }
 0x4c2   :  { %v2095_v59 = vpop.eup %2094 }
 0x4c3   :  { %v1266_v9 = vmul.f32 %v2095_v59, %v1261_v38  ;;  %v1374_v13 = vpop.xlane.xlu0 %1373  ;;  %vm1271_vm6 = vweird.f32 %v2095_v59 }
 0x4c4   :  { %2096 = vrcp.f32 %v1374_v13  ;;  %vm1272_vm8 = vmor %vm1270_vm7, %vm1271_vm6  ;;  %v1389_v37 = vand.u32 2147483648, %v1374_v13  ;;  %v1387_v16 = vand.u32 2147483647, %v1374_v13  ;;  %vm1383_vm11 = vweird.f32 %v1374_v13 }
 0x4c5   :  { %v1267_v14 = vsub.f32 1.0, %v1266_v9 }
 0x4c6   :  { %v1390_v50 = vor.u32 1.1754944e-38, %v1389_v37  ;;  %vm1388_vm13 = vcmp.eq.f32.partialorder %v1387_v16, 8.507059e+37 }
 0x4c7   :  { %v1268_v15 = vmul.f32 %v2095_v59, %v1267_v14 }
 0x4c9   :  { %v1269_v19 = vadd.f32 %v2095_v59, %v1268_v15 }
 0x4ca   :  { %v2097_v22 = vpop.eup %2096  ;;  %v2789_v28 = vpop.xlane.xlu1 %1035 }
 0x4cb   :  { %v1379_v23 = vmul.f32 %v2097_v22, %v1374_v13  ;;  %v2791_v29 = vpop.xlane.xlu0 %1486  ;;  %v1273_v30 = vsel %vm1272_vm8, %v2095_v59, %v1269_v19  ;;  %2098 = vrcp.f32 %v2789_v28  ;;  %vm1384_vm10 = vweird.f32 %v2097_v22 }
 0x4cc   :  { %2100 = vrcp.f32 %v2791_v29  ;;  %v1278_v33 = vsel %vm1275_vm9, %v1277_v53, %v1273_v30  ;;  %vm1385_vm12 = vmor %vm1383_vm11, %vm1384_vm10  ;;  %v1063_v25 = vand.u32 2147483648, %v2789_v28  ;;  %v1502_v31 = vand.u32 2147483648, %v2791_v29 }
 0x4cd   :  { %v1380_v32 = vsub.f32 1.0, %v1379_v23  ;;  %v1279_v34 = vmul.f32 %v2698_v57, %v1278_v33  ;;  %v1061_v61 = vand.u32 2147483647, %v2789_v28  ;;  %v1500_v63 = vand.u32 2147483647, %v2791_v29 }
 0x4ce   :  { %vm1057_vm14 = vweird.f32 %v2789_v28  ;;  %v1064_v1 = vor.u32 1.1754944e-38, %v1063_v25  ;;  %vm1496_vm15 = vweird.f32 %v2791_v29  ;;  %v1503_v4 = vor.u32 1.1754944e-38, %v1502_v31 }
 0x4cf   :  { %v1381_v36 = vmul.f32 %v2097_v22, %v1380_v32  ;;  %1296 = vrot.lane.b32.xlu2 %v1279_v34, %s2387_s7  ;;  %vm2820_vm6 = vcmp.eq.f32.partialorder %v1061_v61, 8.507059e+37  ;;  %vm2826_vm9 = vcmp.eq.f32.partialorder %v1500_v63, 8.507059e+37 }
 0x4d1   :  { %v1382_v39 = vadd.f32 %v2097_v22, %v1381_v36  ;;  %v2099_v40 = vpop.eup %2098 }
 0x4d2   :  { %v2797_v41 = vpop.xlane.xlu2 %1032  ;;  %v2101_v42 = vpop.eup %2100  ;;  %v1053_v44 = vmul.f32 %v2099_v40, %v2789_v28  ;;  %vm1058_vm2 = vweird.f32 %v2099_v40 }
 0x4d3   :  { %2102 = vrcp.f32 %v2797_v41  ;;  %v2801_v45 = vpop.xlane.xlu0 %1599  ;;  %v1492_v57 = vmul.f32 %v2101_v42, %v2791_v29  ;;  %v1386_v54 = vsel %vm1385_vm12, %v2097_v22, %v1382_v39  ;;  %vm1497_vm7 = vweird.f32 %v2101_v42  ;;  %vm1059_vm10 = vmor %vm1057_vm14, %vm1058_vm2 }
 0x4d4   :  { %2104 = vrcp.f32 %v2801_v45  ;;  %v1054_v52 = vsub.f32 1.0, %v1053_v44  ;;  %v1391_v56 = vsel %vm1388_vm13, %v1390_v50, %v1386_v54  ;;  %vm1042_vm8 = vweird.f32 %v2797_v41  ;;  %vm1498_vm11 = vmor %vm1496_vm15, %vm1497_vm7 }
 0x4d5   :  { %v1493_v55 = vsub.f32 1.0, %v1492_v57  ;;  %v1392_v60 = vmul.f32 %v2700_v58, %v1391_v56  ;;  %2106 = vrcp.f32 %v2787_v10  ;;  %v1048_v14 = vand.u32 2147483648, %v2797_v41 }
 0x4d6   :  { %v1055_v51 = vmul.f32 %v2099_v40, %v1054_v52  ;;  %v1615_v17 = vand.u32 2147483648, %v2801_v45  ;;  %v1046_v22 = vand.u32 2147483647, %v2797_v41  ;;  %v1613_v29 = vand.u32 2147483647, %v2801_v45 }
 0x4d7   :  { %v1494_v62 = vmul.f32 %v2101_v42, %v1493_v55  ;;  %1409 = vrot.lane.b32.xlu2 %v1392_v60, %s2396_s8  ;;  %v1049_v36 = vor.u32 1.1754944e-38, %v1048_v14  ;;  %vm1609_vm14 = vweird.f32 %v2801_v45 }
 0x4d8   :  { %v1056_v58 = vadd.f32 %v2099_v40, %v1055_v51  ;;  %vm1047_vm2 = vcmp.eq.f32.partialorder %v1046_v22, 8.507059e+37  ;;  %vm1614_vm7 = vcmp.eq.f32.partialorder %v1613_v29, 8.507059e+37 }
 0x4d9   :  { %v2103_v0 = vpop.eup %2102  ;;  %v1495_v59 = vadd.f32 %v2101_v42, %v1494_v62 }
 0x4da   :  { %v2105_v2 = vpop.eup %2104  ;;  %v1038_v5 = vmul.f32 %v2103_v0, %v2797_v41  ;;  %v1060_v19 = vsel %vm1059_vm10, %v2099_v40, %v1056_v58  ;;  %vm1043_vm12 = vweird.f32 %v2103_v0  ;;  %v2852_v44 = vpop.xlane.xlu1 %1715 }
 0x4db   :  { %v1605_v6 = vmul.f32 %v2105_v2, %v2801_v45  ;;  %v2816_v7 = vpop.xlane.xlu2 %1263  ;;  %v2818_v8 = vpop.xlane.xlu0 %1150  ;;  %v1065_v30 = vsel %vm2820_vm6, %v1064_v1, %v1060_v19  ;;  %v1499_v32 = vsel %vm1498_vm11, %v2101_v42, %v1495_v59  ;;  %vm1610_vm13 = vweird.f32 %v2105_v2  ;;  %vm1044_vm15 = vmor %vm1042_vm8, %vm1043_vm12 }
 0x4dc   :  { %v1039_v9 = vsub.f32 1.0, %v1038_v5  ;;  %2108 = vrcp.f32 %v2816_v7  ;;  %v2839_v53 = vpop.eup %2106  ;;  %v1066_v33 = vmul.f32 %v2714_v11, %v1065_v30  ;;  %v1504_v28 = vsel %vm2826_vm9, %v1503_v4, %v1499_v32  ;;  %vm1611_vm6 = vmor %vm1609_vm14, %vm1610_vm13 }
 0x4dd   :  { %v1606_v15 = vsub.f32 1.0, %v1605_v6  ;;  %2110 = vrcp.f32 %v2818_v8  ;;  %v1505_v37 = vmul.f32 %v2708_v3, %v1504_v28  ;;  %v1616_v42 = vor.u32 1.1754944e-38, %v1615_v17 }
 0x4de   :  { %v1040_v18 = vmul.f32 %v2103_v0, %v1039_v9  ;;  %1097 = vrot.lane.b32.xlu1 %v1066_v33, %s2384_s17  ;;  %v1718_v31 = vmul.f32 %v2839_v53, %v2787_v10  ;;  %v1178_v56 = vand.u32 2147483648, %v2818_v8  ;;  %v1176_v62 = vand.u32 2147483647, %v2818_v8 }
 0x4df   :  { %v1607_v23 = vmul.f32 %v2105_v2, %v1606_v15  ;;  %1522 = vrot.lane.b32.xlu2 %v1505_v37, %s2397_s10  ;;  %vm1172_vm9 = vweird.f32 %v2818_v8  ;;  %v1291_v58 = vand.u32 2147483648, %v2816_v7  ;;  %vm1285_vm13 = vweird.f32 %v2816_v7 }
 0x4e0   :  { %v1041_v34 = vadd.f32 %v2103_v0, %v1040_v18  ;;  %v1179_v1 = vor.u32 1.1754944e-38, %v1178_v56  ;;  %vm1177_vm11 = vcmp.eq.f32.partialorder %v1176_v62, 8.507059e+37  ;;  %v1289_v59 = vand.u32 2147483647, %v2816_v7 }
 0x4e1   :  { %v1608_v39 = vadd.f32 %v2105_v2, %v1607_v23  ;;  %v1292_v17 = vor.u32 1.1754944e-38, %v1291_v58  ;;  %v1728_v19 = vand.u32 2147483648, %v2787_v10  ;;  %v1726_v30 = vand.u32 2147483647, %v2787_v10 }
 0x4e2   :  { %v2109_v16 = vpop.eup %2108  ;;  %v1045_v40 = vsel %vm1044_vm15, %v2103_v0, %v1041_v34  ;;  %v1719_v0 = vsub.f32 1.0, %v1718_v31  ;;  %vm1290_vm15 = vcmp.eq.f32.partialorder %v1289_v59, 8.507059e+37  ;;  %v2052_v59 = vunpack.i.l.bf16 %v2683_v35 }
 0x4e3   :  { %v2111_v11 = vpop.eup %2110  ;;  %v1281_v50 = vmul.f32 %v2109_v16, %v2816_v7  ;;  %v2856_v45 = vpop.xlane.xlu2 %1376  ;;  %v1050_v3 = vsel %vm1047_vm2, %v1049_v36, %v1045_v40  ;;  %v1612_v41 = vsel %vm1611_vm6, %v2105_v2, %v1608_v39  ;;  %vm1286_vm12 = vweird.f32 %v2109_v16 }
 0x4e4   :  { %v1168_v57 = vmul.f32 %v2111_v11, %v2818_v8  ;;  %2112 = vrcp.f32 %v2856_v45  ;;  %v1051_v25 = vmul.f32 %v2689_v49, %v1050_v3  ;;  %v1617_v54 = vsel %vm1614_vm7, %v1616_v42, %v1612_v41  ;;  %vm1287_vm14 = vmor %vm1285_vm13, %vm1286_vm12 }
 0x4e5   :  { %v1282_v52 = vsub.f32 1.0, %v1281_v50  ;;  %2114 = vrcp.f32 %v2852_v44  ;;  %v1618_v51 = vmul.f32 %v2716_v12, %v1617_v54  ;;  %vm1173_vm8 = vweird.f32 %v2111_v11 }
 0x4e6   :  { %v1169_v55 = vsub.f32 1.0, %v1168_v57  ;;  %1068 = vrot.lane.b32.xlu0 %v1051_v25, %s2384_s17  ;;  %vm1174_vm10 = vmor %vm1172_vm9, %vm1173_vm8  ;;  %v1720_v9 = vmul.f32 %v2839_v53, %v1719_v0  ;;  %vm1723_vm2 = vweird.f32 %v2839_v53  ;;  %vm1722_vm7 = vweird.f32 %v2787_v10  ;;  %s1917_s17 = sshll.u32 %s2974_s11, 4  ;;  %s1918_s17 = int_to_ptr.hbm [resolvable:$true] %s1917_s17 }
 0x4e7   :  { %v1283_v60 = vmul.f32 %v2109_v16, %v1282_v52  ;;  %1635 = vrot.lane.b32.xlu2 %v1618_v51, %s2398_s3  ;;  %v1404_v23 = vand.u32 2147483648, %v2856_v45  ;;  %vm1398_vm8 = vweird.f32 %v2856_v45  ;;  %vm1724_vm9 = vmor %vm1722_vm7, %vm1723_vm2  ;;  %v1402_v33 = vand.u32 2147483647, %v2856_v45 }
 0x4e8   :  { %v1170_v61 = vmul.f32 %v2111_v11, %v1169_v55  ;;  %v1721_v7 = vadd.f32 %v2839_v53, %v1720_v9  ;;  %v1729_v29 = vor.u32 1.1754944e-38, %v1728_v19 }
 0x4e9   :  { %v1284_v12 = vadd.f32 %v2109_v16, %v1283_v60  ;;  %v1405_v10 = vor.u32 1.1754944e-38, %v1404_v23  ;;  %vm1403_vm12 = vcmp.eq.f32.partialorder %v1402_v33, 8.507059e+37 }
 0x4ea   :  { %v2113_v63 = vpop.eup %2112  ;;  %v1171_v49 = vadd.f32 %v2111_v11, %v1170_v61  ;;  %v1725_v34 = vsel %vm1724_vm9, %v2839_v53, %v1721_v7 }
 0x4eb   :  { %v1394_v2 = vmul.f32 %v2113_v63, %v2856_v45  ;;  %v2871_v4 = vpop.eup %2114  ;;  %v1288_v15 = vsel %vm1287_vm14, %v2109_v16, %v1284_v12  ;;  %vm1399_vm6 = vweird.f32 %v2113_v63  ;;  %vm1737_vm14 = vweird.f32 %v2852_v44 }
 0x4ec   :  { %v1175_v5 = vsel %vm1174_vm10, %v2111_v11, %v1171_v49  ;;  %v1733_v13 = vmul.f32 %v2871_v4, %v2852_v44  ;;  %vm1400_vm10 = vmor %vm1398_vm8, %vm1399_vm6  ;;  %vm1738_vm13 = vweird.f32 %v2871_v4  ;;  %v1741_v16 = vand.u32 2147483647, %v2852_v44 }
 0x4ed   :  { %v1395_v6 = vsub.f32 1.0, %v1394_v2  ;;  %v1180_v38 = vsel %vm1177_vm11, %v1179_v1, %v1175_v5  ;;  %vm1727_vm11 = vcmp.eq.f32.partialorder %v1726_v30, 8.507059e+37 }
 0x4ee   :  { %v1181_v8 = vmul.f32 %v2724_v20, %v1180_v38  ;;  %1637 = vrot.lane.b32.xlu0 %v2590_v46, %s2387_s7  ;;  %v1734_v18 = vsub.f32 1.0, %v1733_v13  ;;  %v1293_v20 = vsel %vm1290_vm15, %v1292_v17, %v1288_v15  ;;  %v1730_v37 = vsel %vm1727_vm11, %v1729_v29, %v1725_v34  ;;  %vm1739_vm15 = vmor %vm1737_vm14, %vm1738_vm13 }
 0x4ef   :  { %v1396_v14 = vmul.f32 %v2113_v63, %v1395_v6  ;;  %1665 = vrot.lane.b32.xlu2 %v2595_v48, %s2387_s7  ;;  %v1294_v32 = vmul.f32 %v2735_v26, %v1293_v20  ;;  %v1731_v53 = vmul.f32 %v2726_v21, %v1730_v37  ;;  %vm1742_vm2 = vcmp.eq.f32.partialorder %v1741_v16, 8.507059e+37 }
 0x4f0   :  { %1211 = vrot.lane.b32.xlu1 %v1181_v8, %s2388_s20  ;;  %v1735_v28 = vmul.f32 %v2871_v4, %v1734_v18  ;;  %v2053_v6 = vunpack.i.h.bf16 %v2683_v35  ;;  %vm1863_vm14 = vcmask 97280  }
 0x4f1   :  { %v1397_v22 = vadd.f32 %v2113_v63, %v1396_v14 }
 0x4f2   :  { %v1736_v39 = vadd.f32 %v2871_v4, %v1735_v28 }
 0x4f3   :  { %v1401_v36 = vsel %vm1400_vm10, %v2113_v63, %v1397_v22 }
 0x4f4   :  { %v1406_v26 = vsel %vm1403_vm12, %v1405_v10, %v1401_v36 }
 0x4f5   :  { %v1407_v40 = vmul.f32 %v2741_v27, %v1406_v26 }
 0x4f6   :  { %1750 = vrot.lane.b32.xlu0 %v2590_v46, %s2389_s21  ;;  %v1743_v46 = vand.u32 2147483648, %v2852_v44 }
 0x4f7   :  { %1778 = vrot.lane.b32.xlu2 %v2595_v48, %s2389_s21  ;;  %v1740_v48 = vsel %vm1739_vm15, %v2871_v4, %v1736_v39  ;;  %vm1868_vm15 = vcmask 162816  }
 0x4f8   :  { %1324 = vrot.lane.b32.xlu1 %v1294_v32, %s2387_s7  ;;  %v1744_v11 = vor.u32 1.1754944e-38, %v1743_v46 }
 0x4fa   :  { %v1745_v42 = vsel %vm1742_vm2, %v1744_v11, %v1740_v48  ;;  %v1879_v48 = vld [vmem:[#allocation11 + $0x18] sm:$0xff]  ;;  %v1878_v11 = vld [vmem:[#allocation11 + $0x10] sm:$0xff]  ;;  %vm1873_vm2 = vcmask 228352  }
 0x4fb   :  { %v1746_v50 = vmul.f32 %v2733_v24, %v1745_v42  ;;  %v1877_v42 = vld [vmem:[#allocation11 + $0x8] sm:$0xff] }
 0x4fe   :  { %1748 = vrot.lane.b32.xlu0 %v1731_v53, %s2399_s12 }
 0x500   :  { %1437 = vrot.lane.b32.xlu1 %v1407_v40, %s2396_s8 }
 0x506   :  { %v1490_v45 = vpop.xlane.xlu0 %1489  ;;  %1776 = vrot.lane.b32.xlu0 %v1746_v50, %s2399_s12  ;;  %v1876_v50 = vld [vmem:[#allocation11] sm:$0xff] }
 0x507   :  { %2116 = vrcp.f32 %v1490_v45  ;;  %v1517_v41 = vand.u32 2147483648, %v1490_v45  ;;  %v1515_v52 = vand.u32 2147483647, %v1490_v45  ;;  %vm1511_vm7 = vweird.f32 %v1490_v45 }
 0x509   :  { %v1518_v54 = vor.u32 1.1754944e-38, %v1517_v41  ;;  %vm1516_vm9 = vcmp.eq.f32.partialorder %v1515_v52, 8.507059e+37 }
 0x50d   :  { %v2117_v21 = vpop.eup %2116 }
 0x50e   :  { %v1507_v44 = vmul.f32 %v2117_v21, %v1490_v45  ;;  %v1603_v3 = vpop.xlane.xlu2 %1602  ;;  %vm1512_vm6 = vweird.f32 %v2117_v21 }
 0x50f   :  { %2118 = vrcp.f32 %v1603_v3  ;;  %vm1513_vm8 = vmor %vm1511_vm7, %vm1512_vm6  ;;  %v1630_v62 = vand.u32 2147483648, %v1603_v3  ;;  %v1628_v49 = vand.u32 2147483647, %v1603_v3  ;;  %vm1624_vm11 = vweird.f32 %v1603_v3 }
 0x510   :  { %v1508_v27 = vsub.f32 1.0, %v1507_v44 }
 0x511   :  { %v1631_v1 = vor.u32 1.1754944e-38, %v1630_v62  ;;  %vm1629_vm13 = vcmp.eq.f32.partialorder %v1628_v49, 8.507059e+37 }
 0x512   :  { %v1509_v57 = vmul.f32 %v2117_v21, %v1508_v27 }
 0x514   :  { %v1510_v25 = vadd.f32 %v2117_v21, %v1509_v57 }
 0x515   :  { %v2119_v55 = vpop.eup %2118 }
 0x516   :  { %v1514_v31 = vsel %vm1513_vm8, %v2117_v21, %v1510_v25  ;;  %v1620_v24 = vmul.f32 %v2119_v55, %v1603_v3  ;;  %v1184_v56 = vpop.permute.xlu2 %1183  ;;  %vm1625_vm10 = vweird.f32 %v2119_v55 }
 0x517   :  { %v1519_v51 = vsel %vm1516_vm9, %v1518_v54, %v1514_v31  ;;  %1982 = vmatmul.msk.f32.vlgmr.msra.gmra.mxu2 %vm520_vm4, %v1184_v56  ;;  %vm1626_vm12 = vmor %vm1624_vm11, %vm1625_vm10 }
 0x518   :  { %v1520_v60 = vmul.f32 %v2757_v43, %v1519_v51  ;;  %v1621_v61 = vsub.f32 1.0, %v1620_v24 }
 0x51a   :  { %1550 = vrot.lane.b32.xlu1 %v1520_v60, %s2397_s10  ;;  %v1622_v63 = vmul.f32 %v2119_v55, %v1621_v61  ;;  %v984_v32 = vpop.f32.mrf.mxu0 }
 0x51c   :  { %v1623_v0 = vadd.f32 %v2119_v55, %v1622_v63 }
 0x51e   :  { %v1627_v2 = vsel %vm1626_vm12, %v2119_v55, %v1623_v0 }
 0x51f   :  { %v1632_v4 = vsel %vm1629_vm13, %v1631_v1, %v1627_v2 }
 0x520   :  { %v1633_v5 = vmul.f32 %v2762_v47, %v1632_v4 }
 0x522   :  { %1663 = vrot.lane.b32.xlu1 %v1633_v5, %s2398_s3 }
 0x529   :  { %v1297_v12 = vpop.permute.xlu2 %1296 }
 0x52a   :  { %v1007_v33 = vpop.f32.mrf.mxu0 }
 0x531   :  { %v1410_v43 = vpop.permute.xlu2 %1409 }
 0x532   :  { %1986 = vmatmul.msk.f32.vlgmr.msrb.gmra.mxu2 %vm520_vm4, %v1410_v43 }
 0x539   :  { %v1523_v58 = vpop.permute.xlu2 %1522 }
 0x541   :  { %v1636_v8 = vpop.permute.xlu2 %1635 }
 0x549   :  { %v1666_v47 = vpop.permute.xlu2 %1665 }
 0x550   :  { %v1098_v38 = vpop.permute.xlu1 %1097 }
 0x551   :  { %1981 = vmatmul.msk.f32.vlgmr.msrb.gmra.mxu1 %vm520_vm4, %v1098_v38  ;;  %v1779_v35 = vpop.permute.xlu2 %1778 }
 0x552   :  { %1572 = vmatpush.msrb.mxu1 %v2053_v6 }
 0x558   :  { %v1069_v9 = vpop.permute.xlu0 %1068 }
 0x559   :  { %1980 = vmatmul.msk.f32.vlgmr.msrb.gmra.mxu0 %vm520_vm4, %v1069_v9 }
 0x55a   :  { %1544 = vmatpush.msrb.mxu0 %v2052_v59 }
 0x560   :  { %v1638_v13 = vpop.permute.xlu0 %1637 }
 0x561   :  { %1984 = vmatmul.msk.f32.vlgmr.msra.gmra.mxu0 %vm520_vm4, %v1297_v12  ;;  %1657 = vmatpush.msra.mxu2 %v1638_v13 }
 0x562   :  { %v1212_v14 = vpop.permute.xlu1 %1211  ;;  %1990 = vmatmul.msk.f32.vlgmr.msra.gmra.mxu2 %vm520_vm4, %v1636_v8 }
 0x563   :  { %1983 = vmatmul.msk.f32.vlgmr.msra.gmra.mxu3 %vm520_vm4, %v1212_v14  ;;  %1898 = vmatpush.msrb.mxu2 %v1879_v48 }
 0x564   :  { %1685 = vmatpush.msra.mxu3 %v1666_v47 }
 0x565   :  { %1899 = vmatpush.msrb.mxu2 %v1878_v11 }
 0x567   :  { %1900 = vmatpush.msrb.mxu2 %v1877_v42 }
 0x568   :  { %v1751_v15 = vpop.permute.xlu0 %1750 }
 0x569   :  { %1988 = vmatmul.msk.f32.vlgmr.msrb.gmra.mxu0 %vm520_vm4, %v1523_v58  ;;  %1901 = vmatpush.msrb.mxu2 %v1876_v50 }
 0x56a   :  { %v1325_v17 = vpop.permute.xlu1 %1324  ;;  %1770 = vmatpush.msra.mxu0 %v1751_v15 }
 0x56b   :  { %1985 = vmatmul.msk.f32.vlgmr.msra.gmra.mxu1 %vm520_vm4, %v1325_v17 }
 0x56c   :  { %1798 = vmatpush.msra.mxu1 %v1779_v35 }
 0x570   :  { %v1749_v18 = vpop.permute.xlu0 %1748 }
 0x571   :  { %1992 = vmatmul.msk.f32.vlgmr.msra.gmra.mxu0 %vm520_vm4, %v1749_v18 }
 0x572   :  { %v1438_v20 = vpop.permute.xlu1 %1437 }
 0x573   :  { %1987 = vmatmul.msk.f32.vlgmr.msrb.gmra.mxu3 %vm520_vm4, %v1438_v20 }
 0x578   :  { %v1777_v19 = vpop.permute.xlu0 %1776 }
 0x58c   :  { %v1551_v7 = vpop.permute.xlu1 %1550 }
 0x58d   :  { %1989 = vmatmul.msk.f32.vlgmr.msrb.gmra.mxu1 %vm520_vm4, %v1551_v7 }
 0x594   :  { %v1664_v22 = vpop.permute.xlu1 %1663 }
 0x595   :  { %1993 = vmatmul.msk.f32.vlgmr.msra.gmra.mxu1 %vm520_vm4, %v1777_v19  ;;  %1991 = vmatmul.msk.f32.vlgmr.msra.gmra.mxu3 %vm520_vm4, %v1664_v22 }
 0x59a   :  { %v1207_v23 = vpop.f32.mrf.mxu2 }
 0x59b   :  { %1813 = vrot.lane.b32.xlu0 %v1207_v23, %s2374_s26 }
 0x5b5   :  { %v1433_v30 = vpop.f32.mrf.mxu2 }
 0x5b6   :  { %1829 = vrot.lane.b32.xlu2 %v1433_v30, %s2391_s23 }
 0x5ce   :  { %v1122_v28 = vpop.f32.mrf.mxu1 }
 0x5cf   :  { %1807 = vrot.lane.b32.xlu2 %v1122_v28, %s2400_s13 }
 0x5d6   :  { %v1093_v34 = vpop.f32.mrf.mxu0 }
 0x5d7   :  { %1805 = vrot.lane.b32.xlu1 %v1093_v34, %s2400_s13 }
 0x5de   :  { %v1320_v29 = vpop.f32.mrf.mxu0 }
 0x5df   :  { %1821 = vrot.lane.b32.xlu1 %v1320_v29, %s2401_s4 }
 0x5e5   :  { %v1659_v36 = vpop.f32.mrf.mxu2 }
 0x5e6   :  { %v1546_v10 = vpop.f32.mrf.mxu0  ;;  %v1235_v37 = vpop.f32.mrf.mxu3 }
 0x5e7   :  { %1845 = vrot.lane.b32.xlu1 %v1659_v36, %s2390_s22  ;;  %1837 = vrot.lane.b32.xlu0 %v1546_v10, %s2402_s14 }
 0x5e8   :  { %v1348_v26 = vpop.f32.mrf.mxu1 }
 0x5ee   :  { %v1772_v39 = vpop.f32.mrf.mxu0 }
 0x5ef   :  { %1823 = vrot.lane.b32.xlu1 %v1348_v26, %s2401_s4  ;;  %1815 = vrot.lane.b32.xlu0 %v1235_v37, %s2374_s26 }
 0x5f0   :  { %1853 = vrot.lane.b32.xlu2 %v1772_v39, %s2403_s15 }
 0x5f6   :  { %v1461_v46 = vpop.f32.mrf.mxu3 }
 0x5f8   :  { %1831 = vrot.lane.b32.xlu2 %v1461_v46, %s2391_s23 }
 0x60a   :  { %v1574_v53 = vpop.f32.mrf.mxu1 }
 0x60b   :  { %1839 = vrot.lane.b32.xlu0 %v1574_v53, %s2402_s14 }
 0x60d   :  { %v1814_v44 = vpop.permute.xlu0 %1813 }
 0x610   :  { %v1830_v21 = vpop.permute.xlu2 %1829 }
 0x612   :  { %v1800_v16 = vpop.f32.mrf.mxu1 }
 0x613   :  { %1855 = vrot.lane.b32.xlu2 %v1800_v16, %s2403_s15 }
 0x618   :  { %v1687_v40 = vpop.f32.mrf.mxu3 }
 0x619   :  { %1847 = vrot.lane.b32.xlu1 %v1687_v40, %s2390_s22 }
 0x629   :  { %v1808_v41 = vpop.permute.xlu2 %1807 }
 0x62a   :  { %v1860_v61 = vsel %vm269_vm1, %v1007_v33, %v1808_v41 }
 0x649   :  { %v1806_v45 = vpop.permute.xlu1 %1805 }
 0x64a   :  { %v1859_v27 = vsel %vm269_vm1, %v984_v32, %v1806_v45  ;;  %v1854_v24 = vpop.permute.xlu2 %1853 }
 0x64b   :  { %v1861_v57 = vsel %vm520_vm4, %v1859_v27, %v1814_v44 }
 0x651   :  { %v1822_v3 = vpop.permute.xlu1 %1821 }
 0x652   :  { %v1864_v52 = vsel %vm1863_vm14, %v1861_v57, %v1822_v3  ;;  %v1832_v63 = vpop.permute.xlu2 %1831 }
 0x653   :  { %v1866_v54 = vsel %vm522_vm3, %v1864_v52, %v1830_v21 }
 0x659   :  { %v1846_v25 = vpop.permute.xlu1 %1845  ;;  %v1838_v55 = vpop.permute.xlu0 %1837 }
 0x65a   :  { %v1869_v31 = vsel %vm1868_vm15, %v1866_v54, %v1838_v55 }
 0x65b   :  { %v1871_v56 = vsel %vm524_vm5, %v1869_v31, %v1846_v25 }
 0x65c   :  { %v1874_v51 = vsel %vm1873_vm2, %v1871_v56, %v1854_v24 }
 0x65d   :  { %1994 = vmatmul.msk.f32.vlgmr.msrb.gmra.mxu2 %vm185_vm0, %v1874_v51 }
 0x661   :  { %v1816_v60 = vpop.permute.xlu0 %1815  ;;  %v1824_v62 = vpop.permute.xlu1 %1823 }
 0x662   :  { %v1862_v49 = vsel %vm520_vm4, %v1860_v61, %v1816_v60 }
 0x663   :  { %v1865_v0 = vsel %vm1863_vm14, %v1862_v49, %v1824_v62 }
 0x664   :  { %v1867_v2 = vsel %vm522_vm3, %v1865_v0, %v1832_v63 }
 0x66d   :  { %v1856_v12 = vpop.permute.xlu2 %1855 }
 0x67d   :  { %v1840_v1 = vpop.permute.xlu0 %1839 }
 0x67e   :  { %v1870_v4 = vsel %vm1868_vm15, %v1867_v2, %v1840_v1 }
 0x68b   :  { %v1848_v5 = vpop.permute.xlu1 %1847 }
 0x68c   :  { %v1872_v43 = vsel %vm524_vm5, %v1870_v4, %v1848_v5 }
 0x68d   :  { %v1875_v58 = vsel %vm1873_vm2, %v1872_v43, %v1856_v12 }
 0x68e   :  { %1995 = vmatmul.msk.f32.gmra.mxu2 %vm185_vm0, %v1875_v58 }
 0x6e0   :  { %v1903_v6 = vpop.f32.mrf.mxu2 }
 0x6e1   :  { %1909 = vst.msk [vmem:[#allocation17] sm:$0xff] %vm185_vm0, %v1903_v6 }
 0x711   :  { %v1906_v38 = vpop.f32.mrf.mxu2 }
 0x712   :  { %1910 = vst.msk [vmem:[#allocation17 + $0x8] sm:$0xff] %vm185_vm0, %v1906_v38 }
 0x713   :  { %1923 = dma.vmem_to_hbm [thread:$0]  %s1916_s6, 256, %s1918_s17, [#allocation4], %s2373_s25, %s2373_s25, %s2374_s26  }
 0x714   :  { %2370 = dma.done.wait [#allocation4], 256  }
 0x715   :  { %2371 = vsyncadd [#allocation4], 4294967040 }
 0x716   :  { %1928 = vsyncpa [#allocation3], 1 }
 0x717   :  { %1929 = vsyncpa [#allocation6], 1 }
 0x718   :  { %1930 = vsyncpa [#allocation9], 1 }
 0x719   :  { %1931 = vsyncpa [#allocation12], 1 }
 0x71a   :  { %1932 = vsyncpa [#allocation15], 1 }
 0x71b   :  { %1933 = vsyncpa [#allocation4], 1 }

</bundles_post_ra>
